<compile_context>
chip_gen: v7x
topology: tpu7x:2x2x1
jax: 0.10.0
libtpu: 0.0.40
codegen_flags: <defaults>
</compile_context>

<pallas_src>
import functools

import jax
import jax.numpy as jnp
from jax import lax
from jax.experimental import pallas as pl
from jax.experimental.pallas import tpu as pltpu


def _detect_num_tensorcores():
    """2 on v7x-style multi-TensorCore chips, else 1. Safe fallback: 1."""
    try:
        kind = jax.devices()[0].device_kind.lower()
    except Exception:
        return 1
    return 2 if ("v7" in kind or "7x" in kind) else 1


def _ssd_loss_kernel(confs_ref, labels_ref, bbox_ref, gtb_ref, anch_ref,
                     cls_ref, reg_ref, cnt_ref,
                     cls_part, reg_part, cnt_part,
                     cxy_scale, cxy_off, cwh_off,
                     *, gamma, scale_xy, scale_wh, alpha_bg, alpha_fg,
                     num_anchors, blocks_per_core):
    c = pl.program_id(0)   # anchor-range slice (megacore split on v7x)
    t = pl.program_id(1)   # anchor tile within this slice
    b = pl.program_id(2)   # batch (innermost: anchor-tile DMA + cache reused)

    is_first = (t == 0) & (b == 0)
    is_last = (t == pl.num_programs(1) - 1) & (b == pl.num_programs(2) - 1)

    @pl.when(is_first)
    def _():
        cls_part[...] = jnp.zeros_like(cls_part)
        reg_part[...] = jnp.zeros_like(reg_part)
        cnt_part[...] = jnp.zeros_like(cnt_part)

    # Anchor-derived constants recomputed only when a new anchor tile arrives.
    #   gxy = scale_xy*(gt_xy - a_xy)/a_wh = cxy_scale*gt_xy - cxy_off
    #   gwh = scale_wh*log(gt_wh/a_wh)     = scale_wh*log(gt_wh) + cwh_off
    @pl.when(b == 0)
    def _():
        a = anch_ref[0].astype(jnp.float32)           # (4, TN)
        inv_wh = 1.0 / a[2:, :]                       # (2, TN)
        s = scale_xy * inv_wh
        cxy_scale[...] = s
        cxy_off[...] = s * a[:2, :]
        cwh_off[...] = scale_wh * jnp.log(inv_wh)

    C = confs_ref.shape[1]
    TN = confs_ref.shape[2]

    # ---- validity mask (only needed for the tail / overhang tiles) ----
    blk = c * blocks_per_core + t                     # unclamped global tile index
    start = blk * TN
    lane = lax.broadcasted_iota(jnp.int32, (1, TN), 1)
    valid = (start + lane) < num_anchors              # (1, TN) bool

    # ---- focal classification term (only the one-hot label class contributes) ----
    # Inputs are left unmasked: all ops below are lane-wise, so garbage in padding
    # lanes stays in padding lanes and is killed by the `valid` select at the end.
    p = confs_ref[0].astype(jnp.float32)              # (C, TN)
    lbl = labels_ref[0]                               # (1, TN) int32

    m = jnp.max(p, axis=0, keepdims=True)
    shifted = p - m
    ex = jnp.exp(shifted)                             # (C, TN), EUP
    log_se = jnp.log(jnp.sum(ex, axis=0, keepdims=True))          # (1, TN)
    class_ids = lax.broadcasted_iota(jnp.int32, (C, TN), 0)
    is_y = class_ids == lbl                                        # one-hot (C, TN)
    shifted_y = jnp.sum(jnp.where(is_y, shifted, 0.0), axis=0, keepdims=True)
    log_sm_y = shifted_y - log_se                     # log_softmax at the label class
    sm_y = jnp.exp(log_sm_y)                          # softmax at label (no divide)
    f = 1.0 - sm_y
    if gamma == 2:                                    # static branch
        fg = f * f
    else:
        fg = f ** gamma
    # alpha folded in: alpha[0] = alpha_bg, alpha[c>0] = alpha_fg
    w = jnp.where(lbl == 0, alpha_bg, alpha_fg)       # (1, TN)
    cls_part[...] += jnp.where(valid, w * fg * log_sm_y, 0.0)

    # ---- regression: SmoothL1 (beta=1) on positive anchors only ----
    pos = valid & (lbl > 0)                           # garbage tail labels masked out
    bd = bbox_ref[0].astype(jnp.float32)              # (4, TN)
    gt = gtb_ref[0].astype(jnp.float32)               # (4, TN)
    gxy = cxy_scale[...] * gt[:2, :] - cxy_off[...]   # (2, TN)
    gwh = scale_wh * jnp.log(gt[2:, :]) + cwh_off[...]
    dxy = bd[:2, :] - gxy
    dwh = bd[2:, :] - gwh
    adxy = jnp.abs(dxy)
    adwh = jnp.abs(dwh)
    sl1 = (jnp.where(adxy < 1.0, 0.5 * dxy * dxy, adxy - 0.5)
           + jnp.where(adwh < 1.0, 0.5 * dwh * dwh, adwh - 0.5))   # (2, TN)
    reg_part[...] += jnp.where(pos, sl1, 0.0)         # select kills any NaN/Inf
    cnt_part[...] += jnp.where(pos, 1.0, 0.0)

    # ---- finalize: one cross-lane reduce + store per anchor-range slice ----
    @pl.when(is_last)
    def _():
        cls_ref[0] = jnp.sum(cls_part[...], keepdims=True)   # (1, 1)
        reg_ref[0] = jnp.sum(reg_part[...], keepdims=True)   # (1, 1)
        cnt_ref[0] = jnp.sum(cnt_part[...], keepdims=True)   # (1, 1)


def ssd_multibox_loss2(bbox_delta, confs, gt_bbox, gt_labels, anchors_xywh,
                       *, scale_xy=10.0, scale_wh=5.0, gamma=2,
                       alpha_background=10.0, alpha_foreground=1000.0,
                       tile_n=None, max_tile_n=8192,
                       num_cores=None, gt_bbox_is_transposed=False):
    """Matches SSDMultiboxLoss2.forward. Returns (total_loss, to_log)."""
    B, C, NA = confs.shape

    if tile_n is None:
        tile_n = NA if NA <= max_tile_n else max_tile_n
    assert tile_n == NA or tile_n % 128 == 0, \
        "tile_n must be a multiple of 128 (or the full anchor dim)"

    if gt_bbox_is_transposed:
        gt_bbox_t = gt_bbox                                   # already [B, 4, NA]
    else:
        # TODO(synk): producing gt_bbox as [B, 4, NA] upstream removes this extra
        # full HBM read+write pass (~30-45% of this op's total HBM traffic).
        gt_bbox_t = jnp.transpose(gt_bbox, (0, 2, 1))         # [B, 4, NA]
    labels3 = gt_labels.astype(jnp.int32)[:, None, :]         # [B, 1, NA]

    num_tiles = -(-NA // tile_n)          # ceil-div; tail tile masked in-kernel
    if num_cores is None:
        num_cores = _detect_num_tensorcores()
    NC = max(1, min(int(num_cores), num_tiles))   # never re-stream with an empty slice
    blocks_per_core = -(-num_tiles // NC)

    def _blk(c, t):                       # clamp so overhang blocks stay in range
        return jnp.minimum(c * blocks_per_core + t, num_tiles - 1)

    kernel = functools.partial(
        _ssd_loss_kernel, gamma=gamma, scale_xy=scale_xy, scale_wh=scale_wh,
        alpha_bg=alpha_background, alpha_fg=alpha_foreground,
        num_anchors=NA, blocks_per_core=blocks_per_core)

    cls_out, reg_out, cnt_out = pl.pallas_call(
        kernel,
        out_shape=(
            jax.ShapeDtypeStruct((NC, 1, 1), jnp.float32),
            jax.ShapeDtypeStruct((NC, 1, 1), jnp.float32),
            jax.ShapeDtypeStruct((NC, 1, 1), jnp.float32),
        ),
        grid_spec=pltpu.PrefetchScalarGridSpec(
            num_scalar_prefetch=0,
            grid=(NC, blocks_per_core, B),
            in_specs=[
                pl.BlockSpec((1, C, tile_n), lambda c, t, b: (b, 0, _blk(c, t))),  # confs
                pl.BlockSpec((1, 1, tile_n), lambda c, t, b: (b, 0, _blk(c, t))),  # labels
                pl.BlockSpec((1, 4, tile_n), lambda c, t, b: (b, 0, _blk(c, t))),  # bbox_delta
                pl.BlockSpec((1, 4, tile_n), lambda c, t, b: (b, 0, _blk(c, t))),  # gt_bbox (xywh)
                pl.BlockSpec((1, 4, tile_n), lambda c, t, b: (0, 0, _blk(c, t))),  # anchors
            ],
            out_specs=[
                pl.BlockSpec((1, 1, 1), lambda c, t, b: (c, 0, 0)),
                pl.BlockSpec((1, 1, 1), lambda c, t, b: (c, 0, 0)),
                pl.BlockSpec((1, 1, 1), lambda c, t, b: (c, 0, 0)),
            ],
            scratch_shapes=[
                pltpu.VMEM((1, tile_n), jnp.float32),   # weighted focal partials
                pltpu.VMEM((2, tile_n), jnp.float32),   # smooth-L1 partials (xy+wh folded)
                pltpu.VMEM((1, tile_n), jnp.float32),   # positive-count partials
                pltpu.VMEM((2, tile_n), jnp.float32),   # cached scale_xy / anchor_wh
                pltpu.VMEM((2, tile_n), jnp.float32),   # cached scale_xy * anchor_xy / anchor_wh
                pltpu.VMEM((2, tile_n), jnp.float32),   # cached scale_wh * log(1 / anchor_wh)
            ],
        ),
        # VMEM at tile_n=8192: ~1.4 MiB double-buffered inputs + ~1.5 MiB scratch,
        # far inside the default scoped limit on every generation.
        compiler_params=pltpu.CompilerParams(
            dimension_semantics=("parallel", "arbitrary", "arbitrary")),
    )(confs, labels3, bbox_delta, gt_bbox_t, anchors_xywh)

    # alpha weighting was folded into the kernel, so the class path is one scalar/core.
    classification_loss = -jnp.sum(cls_out) / (B * NA)
    num_pos = jnp.sum(cnt_out)                 # == gt_locations.shape[0] / 4
    # NOTE: matches the PyTorch module (no clamp) -> NaN if there are no positives.
    regression_loss = jnp.sum(reg_out) / num_pos
    total_loss = regression_loss + classification_loss
    to_log = dict(regression_loss=regression_loss,
                  classification_loss=classification_loss,
                  total_loss=total_loss)
    return total_loss, to_log


def _reference(bbox_delta, confs, gt_bbox, gt_labels, anchors_xywh,
               scale_xy=10.0, scale_wh=5.0, gamma=2):
    """Pure-JAX mirror of the PyTorch forward, for verification."""
    B, C, NA = confs.shape
    y = jax.nn.one_hot(gt_labels, C, dtype=jnp.float32)          # [B, NA, C]
    y = jnp.transpose(y, (0, 2, 1))                              # [B, C, NA]
    term1 = (1.0 - jax.nn.softmax(confs, axis=1)) ** gamma
    term2 = jax.nn.log_softmax(confs, axis=1)
    term3 = term1 * y * term2
    alpha = jnp.full((C,), 1000.0, jnp.float32).at[0].set(10.0)
    cls_loss = jnp.sum(jnp.mean(term3, axis=(0, 2)) * (-alpha))

    gtb = jnp.transpose(gt_bbox, (0, 2, 1))                      # [B, 4, NA]
    gxy = scale_xy * (gtb[:, :2, :] - anchors_xywh[:, :2, :]) / anchors_xywh[:, 2:, :]
    gwh = scale_wh * jnp.log(gtb[:, 2:, :] / anchors_xywh[:, 2:, :])
    gt_loc = jnp.concatenate([gxy, gwh], axis=1)                 # [B, 4, NA]
    pos = (gt_labels > 0)[:, None, :]                            # [B, 1, NA]
    diff = bbox_delta - gt_loc
    ad = jnp.abs(diff)
    sl1 = jnp.where(ad < 1.0, 0.5 * diff * diff, ad - 0.5)
    reg = jnp.sum(jnp.where(pos, sl1, 0.0))
    num_pos = jnp.sum(pos.astype(jnp.float32))
    return reg / num_pos + cls_loss


if __name__ == "__main__":
    # Small shapes consistent with [B, num_classes, num_anchors]; NA deliberately
    # NOT a multiple of 128 to exercise the in-kernel tail masking.
    B, C, NA = 2, 9, 1000
    key = jax.random.PRNGKey(0)
    k1, k2, k3, k4, k5 = jax.random.split(key, 5)

    confs = jax.random.normal(k1, (B, C, NA), jnp.float32)
    bbox_delta = jax.random.normal(k2, (B, 4, NA), jnp.float32)
    # gt_bbox in xywh with strictly positive w/h (so log() is well defined)
    gt_bbox = jax.random.uniform(k3, (B, NA, 4), jnp.float32, 0.05, 1.0)
    gt_labels = jax.random.randint(k4, (B, NA), 0, C, jnp.int32)
    # deterministic synthetic anchors (nn.Parameter in the module), shape [1, 4, NA]
    anchors_xywh = jax.random.uniform(k5, (1, 4, NA), jnp.float32, 0.05, 1.0)

    ref = jax.block_until_ready(
        _reference(bbox_delta, confs, gt_bbox, gt_labels, anchors_xywh))

    # scale_xy = 1/0.1, scale_wh = 1/0.2 (typical SSD anchor scales).
    # Configurations cover: full-extent tile + auto core count, small tile with
    # the tail mask + both the 1-core and 2-core anchor-range splits, and the
    # pre-transposed gt_bbox fast path (no wrapper transpose).
    cases = [
        dict(tile_n=None, num_cores=None),
        dict(tile_n=256, num_cores=1),
        dict(tile_n=256, num_cores=2),
    ]
    for cfg in cases:
        total, to_log = ssd_multibox_loss2(
            bbox_delta, confs, gt_bbox, gt_labels, anchors_xywh,
            scale_xy=10.0, scale_wh=5.0, **cfg)
        total = jax.block_until_ready(total)
        assert jnp.allclose(total, ref, rtol=2e-3, atol=2e-3), (cfg, total, ref)

    # Pre-transposed gt_bbox path (the layout the producer should emit).
    gt_bbox_t = jnp.transpose(gt_bbox, (0, 2, 1))
    total, _ = ssd_multibox_loss2(
        bbox_delta, confs, gt_bbox_t, gt_labels, anchors_xywh,
        scale_xy=10.0, scale_wh=5.0, tile_n=256, num_cores=2,
        gt_bbox_is_transposed=True)
    total = jax.block_until_ready(total)
    assert jnp.allclose(total, ref, rtol=2e-3, atol=2e-3), ("transposed", total, ref)

    print("KERNEL_OK")
</pallas_src>

<mosaic_0001>
module attributes {stable_mosaic.version = 11 : i64} {
  func.func @_ssd_loss_kernel(%arg0: i32, %arg1: i32, %arg2: i32, %arg3: memref<1x9x1000xf32, #tpu.memory_space<vmem>>, %arg4: memref<1x1x1000xi32, #tpu.memory_space<vmem>>, %arg5: memref<1x4x1000xf32, #tpu.memory_space<vmem>>, %arg6: memref<1x4x1000xf32, #tpu.memory_space<vmem>>, %arg7: memref<1x4x1000xf32, #tpu.memory_space<vmem>>, %arg8: memref<1x1x1xf32, #tpu.memory_space<vmem>>, %arg9: memref<1x1x1xf32, #tpu.memory_space<vmem>>, %arg10: memref<1x1x1xf32, #tpu.memory_space<vmem>>, %arg11: memref<1x1000xf32, #tpu.memory_space<vmem>>, %arg12: memref<2x1000xf32, #tpu.memory_space<vmem>>, %arg13: memref<1x1000xf32, #tpu.memory_space<vmem>>, %arg14: memref<2x1000xf32, #tpu.memory_space<vmem>>, %arg15: memref<2x1000xf32, #tpu.memory_space<vmem>>, %arg16: memref<2x1000xf32, #tpu.memory_space<vmem>>) attributes {dimension_semantics = [#tpu.dimension_semantics<parallel>, #tpu.dimension_semantics<arbitrary>, #tpu.dimension_semantics<arbitrary>], iteration_bounds = array<i64: 1, 1, 2>, scalar_prefetch = 0 : i64, scratch_operands = 6 : i64, tpu.core_type = #tpu.core_type<tc>, window_params = [{transform_indices = @transform_0, window_bounds = array<i64: 1, 9, 1000>}, {transform_indices = @transform_1, window_bounds = array<i64: 1, 1, 1000>}, {transform_indices = @transform_2, window_bounds = array<i64: 1, 4, 1000>}, {transform_indices = @transform_3, window_bounds = array<i64: 1, 4, 1000>}, {transform_indices = @transform_4, window_bounds = array<i64: 1, 4, 1000>}, {transform_indices = @transform_5, window_bounds = array<i64: 1, 1, 1>}, {transform_indices = @transform_6, window_bounds = array<i64: 1, 1, 1>}, {transform_indices = @transform_7, window_bounds = array<i64: 1, 1, 1>}]} {
    %c0_i32 = arith.constant 0 : i32
    %0 = arith.cmpi eq, %arg1, %c0_i32 : i32
    %c0_i32_0 = arith.constant 0 : i32
    %1 = arith.cmpi eq, %arg2, %c0_i32_0 : i32
    %2 = arith.andi %0, %1 : i1
    %c0_i32_1 = arith.constant 0 : i32
    %3 = arith.cmpi eq, %arg1, %c0_i32_1 : i32
    %c1_i32 = arith.constant 1 : i32
    %4 = arith.cmpi eq, %arg2, %c1_i32 : i32
    %5 = arith.andi %3, %4 : i1
    %6 = arith.extui %2 : i1 to i32
    %c0_i32_2 = arith.constant 0 : i32
    %7 = arith.cmpi ne, %6, %c0_i32_2 : i32
    scf.if %7 {
      %cst_56 = arith.constant 0.000000e+00 : f32
      %111 = vector.broadcast %cst_56 : f32 to vector<1x1000xf32>
      %c0_57 = arith.constant 0 : index
      %c0_58 = arith.constant 0 : index
      %112 = vector.load %arg11[%c0_57, %c0_58] : memref<1x1000xf32, #tpu.memory_space<vmem>>, vector<1x1000xf32>
      tpu.vector_store %arg11[%c0_57, %c0_58], %111 {strides = array<i32>} : memref<1x1000xf32, #tpu.memory_space<vmem>>, vector<1x1000xf32>,
      %cst_59 = arith.constant 0.000000e+00 : f32
      %113 = vector.broadcast %cst_59 : f32 to vector<2x1000xf32>
      %c0_60 = arith.constant 0 : index
      %c0_61 = arith.constant 0 : index
      %114 = vector.load %arg12[%c0_60, %c0_61] : memref<2x1000xf32, #tpu.memory_space<vmem>>, vector<2x1000xf32>
      tpu.vector_store %arg12[%c0_60, %c0_61], %113 {strides = array<i32>} : memref<2x1000xf32, #tpu.memory_space<vmem>>, vector<2x1000xf32>,
      %cst_62 = arith.constant 0.000000e+00 : f32
      %115 = vector.broadcast %cst_62 : f32 to vector<1x1000xf32>
      %c0_63 = arith.constant 0 : index
      %c0_64 = arith.constant 0 : index
      %116 = vector.load %arg13[%c0_63, %c0_64] : memref<1x1000xf32, #tpu.memory_space<vmem>>, vector<1x1000xf32>
      tpu.vector_store %arg13[%c0_63, %c0_64], %115 {strides = array<i32>} : memref<1x1000xf32, #tpu.memory_space<vmem>>, vector<1x1000xf32>,
    } else {
    }
    %c0_i32_3 = arith.constant 0 : i32
    %8 = arith.cmpi eq, %arg2, %c0_i32_3 : i32
    %9 = arith.extui %8 : i1 to i32
    %c0_i32_4 = arith.constant 0 : i32
    %10 = arith.cmpi ne, %9, %c0_i32_4 : i32
    scf.if %10 {
      %c0_56 = arith.constant 0 : index
      %c0_57 = arith.constant 0 : index
      %c0_58 = arith.constant 0 : index
      %111 = vector.load %arg7[%c0_56, %c0_57, %c0_58] : memref<1x4x1000xf32, #tpu.memory_space<vmem>>, vector<1x4x1000xf32>
      %112 = vector.shape_cast %111 : vector<1x4x1000xf32> to vector<4x1000xf32>
      %113 = vector.extract_strided_slice %112 {offsets = [2, 0], sizes = [2, 1000], strides = [1, 1]} : vector<4x1000xf32> to vector<2x1000xf32>
      %cst_59 = arith.constant 1.000000e+00 : f32
      %114 = vector.broadcast %cst_59 : f32 to vector<2x1000xf32>
      %115 = arith.divf %114, %113 : vector<2x1000xf32>
      %cst_60 = arith.constant 1.000000e+01 : f32
      %116 = vector.broadcast %cst_60 : f32 to vector<2x1000xf32>
      %117 = arith.mulf %116, %115 : vector<2x1000xf32>
      %c0_61 = arith.constant 0 : index
      %c0_62 = arith.constant 0 : index
      %118 = vector.load %arg14[%c0_61, %c0_62] : memref<2x1000xf32, #tpu.memory_space<vmem>>, vector<2x1000xf32>
      tpu.vector_store %arg14[%c0_61, %c0_62], %117 {strides = array<i32>} : memref<2x1000xf32, #tpu.memory_space<vmem>>, vector<2x1000xf32>,
      %119 = vector.extract_strided_slice %112 {offsets = [0, 0], sizes = [2, 1000], strides = [1, 1]} : vector<4x1000xf32> to vector<2x1000xf32>
      %120 = arith.mulf %117, %119 : vector<2x1000xf32>
      %c0_63 = arith.constant 0 : index
      %c0_64 = arith.constant 0 : index
      %121 = vector.load %arg15[%c0_63, %c0_64] : memref<2x1000xf32, #tpu.memory_space<vmem>>, vector<2x1000xf32>
      tpu.vector_store %arg15[%c0_63, %c0_64], %120 {strides = array<i32>} : memref<2x1000xf32, #tpu.memory_space<vmem>>, vector<2x1000xf32>,
      %122 = math.log %115 : vector<2x1000xf32>
      %cst_65 = arith.constant 5.000000e+00 : f32
      %123 = vector.broadcast %cst_65 : f32 to vector<2x1000xf32>
      %124 = arith.mulf %123, %122 : vector<2x1000xf32>
      %c0_66 = arith.constant 0 : index
      %c0_67 = arith.constant 0 : index
      %125 = vector.load %arg16[%c0_66, %c0_67] : memref<2x1000xf32, #tpu.memory_space<vmem>>, vector<2x1000xf32>
      tpu.vector_store %arg16[%c0_66, %c0_67], %124 {strides = array<i32>} : memref<2x1000xf32, #tpu.memory_space<vmem>>, vector<2x1000xf32>,
    } else {
    }
    %c1_i32_5 = arith.constant 1 : i32
    %11 = arith.muli %arg0, %c1_i32_5 : i32
    %12 = arith.addi %11, %arg1 : i32
    %c1000_i32 = arith.constant 1000 : i32
    %13 = arith.muli %12, %c1000_i32 : i32
    %14 = tpu.iota {dimensions = array<i32: 1>} : vector<1x1000xi32>
    %15 = vector.broadcast %13 : i32 to vector<1x1000xi32>
    %16 = arith.addi %15, %14 : vector<1x1000xi32>
    %c1000_i32_6 = arith.constant 1000 : i32
    %17 = vector.broadcast %c1000_i32_6 : i32 to vector<1x1000xi32>
    %18 = arith.cmpi slt, %16, %17 : vector<1x1000xi32>
    %c0 = arith.constant 0 : index
    %c0_7 = arith.constant 0 : index
    %c0_8 = arith.constant 0 : index
    %19 = vector.load %arg3[%c0, %c0_7, %c0_8] : memref<1x9x1000xf32, #tpu.memory_space<vmem>>, vector<1x9x1000xf32>
    %20 = vector.shape_cast %19 : vector<1x9x1000xf32> to vector<9x1000xf32>
    %c0_9 = arith.constant 0 : index
    %c0_10 = arith.constant 0 : index
    %c0_11 = arith.constant 0 : index
    %21 = vector.load %arg4[%c0_9, %c0_10, %c0_11] : memref<1x1x1000xi32, #tpu.memory_space<vmem>>, vector<1x1x1000xi32>
    %22 = vector.shape_cast %21 : vector<1x1x1000xi32> to vector<1x1000xi32>
    %cst = arith.constant dense<0xFF800000> : vector<1000xf32>
    %23 = vector.multi_reduction <maximumf>, %20, %cst [0] : vector<9x1000xf32> to vector<1000xf32>
    %24 = vector.shape_cast %23 : vector<1000xf32> to vector<1x1000xf32>
    %25 = vector.broadcast %24 : vector<1x1000xf32> to vector<9x1000xf32>
    %26 = arith.subf %20, %25 : vector<9x1000xf32>
    %27 = math.exp %26 : vector<9x1000xf32>
    %cst_12 = arith.constant dense<0.000000e+00> : vector<1000xf32>
    %28 = vector.multi_reduction <add>, %27, %cst_12 [0] : vector<9x1000xf32> to vector<1000xf32>
    %29 = vector.shape_cast %28 : vector<1000xf32> to vector<1x1000xf32>
    %30 = math.log %29 : vector<1x1000xf32>
    %31 = tpu.iota {dimensions = array<i32: 0>} : vector<9x1000xi32>
    %32 = vector.broadcast %22 : vector<1x1000xi32> to vector<9x1000xi32>
    %33 = arith.cmpi eq, %31, %32 : vector<9x1000xi32>
    %cst_13 = arith.constant 0.000000e+00 : f32
    %34 = vector.broadcast %cst_13 : f32 to vector<9x1000xf32>
    %35 = arith.select %33, %26, %34 : vector<9x1000xi1>, vector<9x1000xf32>
    %cst_14 = arith.constant dense<0.000000e+00> : vector<1000xf32>
    %36 = vector.multi_reduction <add>, %35, %cst_14 [0] : vector<9x1000xf32> to vector<1000xf32>
    %37 = vector.shape_cast %36 : vector<1000xf32> to vector<1x1000xf32>
    %38 = arith.subf %37, %30 : vector<1x1000xf32>
    %39 = math.exp %38 : vector<1x1000xf32>
    %cst_15 = arith.constant 1.000000e+00 : f32
    %40 = vector.broadcast %cst_15 : f32 to vector<1x1000xf32>
    %41 = arith.subf %40, %39 : vector<1x1000xf32>
    %42 = arith.mulf %41, %41 : vector<1x1000xf32>
    %c0_i32_16 = arith.constant 0 : i32
    %43 = vector.broadcast %c0_i32_16 : i32 to vector<1x1000xi32>
    %44 = arith.cmpi eq, %22, %43 : vector<1x1000xi32>
    %cst_17 = arith.constant 1.000000e+01 : f32
    %cst_18 = arith.constant 1.000000e+03 : f32
    %45 = vector.broadcast %cst_17 : f32 to vector<1x1000xf32>
    %46 = vector.broadcast %cst_18 : f32 to vector<1x1000xf32>
    %47 = arith.select %44, %45, %46 : vector<1x1000xi1>, vector<1x1000xf32>
    %c0_19 = arith.constant 0 : index
    %c0_20 = arith.constant 0 : index
    %48 = vector.load %arg11[%c0_19, %c0_20] : memref<1x1000xf32, #tpu.memory_space<vmem>>, vector<1x1000xf32>
    %49 = arith.mulf %47, %42 : vector<1x1000xf32>
    %50 = arith.mulf %49, %38 : vector<1x1000xf32>
    %cst_21 = arith.constant 0.000000e+00 : f32
    %51 = vector.broadcast %cst_21 : f32 to vector<1x1000xf32>
    %52 = arith.select %18, %50, %51 : vector<1x1000xi1>, vector<1x1000xf32>
    %53 = arith.addf %48, %52 : vector<1x1000xf32>
    %c0_22 = arith.constant 0 : index
    %c0_23 = arith.constant 0 : index
    %54 = vector.load %arg11[%c0_22, %c0_23] : memref<1x1000xf32, #tpu.memory_space<vmem>>, vector<1x1000xf32>
    tpu.vector_store %arg11[%c0_22, %c0_23], %53 {strides = array<i32>} : memref<1x1000xf32, #tpu.memory_space<vmem>>, vector<1x1000xf32>,
    %c0_i32_24 = arith.constant 0 : i32
    %55 = vector.broadcast %c0_i32_24 : i32 to vector<1x1000xi32>
    %56 = arith.cmpi sgt, %22, %55 : vector<1x1000xi32>
    %57 = arith.andi %18, %56 : vector<1x1000xi1>
    %c0_25 = arith.constant 0 : index
    %c0_26 = arith.constant 0 : index
    %c0_27 = arith.constant 0 : index
    %58 = vector.load %arg5[%c0_25, %c0_26, %c0_27] : memref<1x4x1000xf32, #tpu.memory_space<vmem>>, vector<1x4x1000xf32>
    %59 = vector.shape_cast %58 : vector<1x4x1000xf32> to vector<4x1000xf32>
    %c0_28 = arith.constant 0 : index
    %c0_29 = arith.constant 0 : index
    %c0_30 = arith.constant 0 : index
    %60 = vector.load %arg6[%c0_28, %c0_29, %c0_30] : memref<1x4x1000xf32, #tpu.memory_space<vmem>>, vector<1x4x1000xf32>
    %61 = vector.shape_cast %60 : vector<1x4x1000xf32> to vector<4x1000xf32>
    %c0_31 = arith.constant 0 : index
    %c0_32 = arith.constant 0 : index
    %62 = vector.load %arg14[%c0_31, %c0_32] : memref<2x1000xf32, #tpu.memory_space<vmem>>, vector<2x1000xf32>
    %63 = vector.extract_strided_slice %61 {offsets = [0, 0], sizes = [2, 1000], strides = [1, 1]} : vector<4x1000xf32> to vector<2x1000xf32>
    %64 = arith.mulf %62, %63 : vector<2x1000xf32>
    %c0_33 = arith.constant 0 : index
    %c0_34 = arith.constant 0 : index
    %65 = vector.load %arg15[%c0_33, %c0_34] : memref<2x1000xf32, #tpu.memory_space<vmem>>, vector<2x1000xf32>
    %66 = arith.subf %64, %65 : vector<2x1000xf32>
    %67 = vector.extract_strided_slice %61 {offsets = [2, 0], sizes = [2, 1000], strides = [1, 1]} : vector<4x1000xf32> to vector<2x1000xf32>
    %68 = math.log %67 : vector<2x1000xf32>
    %cst_35 = arith.constant 5.000000e+00 : f32
    %69 = vector.broadcast %cst_35 : f32 to vector<2x1000xf32>
    %70 = arith.mulf %69, %68 : vector<2x1000xf32>
    %c0_36 = arith.constant 0 : index
    %c0_37 = arith.constant 0 : index
    %71 = vector.load %arg16[%c0_36, %c0_37] : memref<2x1000xf32, #tpu.memory_space<vmem>>, vector<2x1000xf32>
    %72 = arith.addf %70, %71 : vector<2x1000xf32>
    %73 = vector.extract_strided_slice %59 {offsets = [0, 0], sizes = [2, 1000], strides = [1, 1]} : vector<4x1000xf32> to vector<2x1000xf32>
    %74 = arith.subf %73, %66 : vector<2x1000xf32>
    %75 = vector.extract_strided_slice %59 {offsets = [2, 0], sizes = [2, 1000], strides = [1, 1]} : vector<4x1000xf32> to vector<2x1000xf32>
    %76 = arith.subf %75, %72 : vector<2x1000xf32>
    %77 = math.absf %74 : vector<2x1000xf32>
    %78 = math.absf %76 : vector<2x1000xf32>
    %cst_38 = arith.constant 1.000000e+00 : f32
    %79 = vector.broadcast %cst_38 : f32 to vector<2x1000xf32>
    %80 = arith.cmpf olt, %77, %79 : vector<2x1000xf32>
    %cst_39 = arith.constant 5.000000e-01 : f32
    %81 = vector.broadcast %cst_39 : f32 to vector<2x1000xf32>
    %82 = arith.mulf %81, %74 : vector<2x1000xf32>
    %83 = arith.mulf %82, %74 : vector<2x1000xf32>
    %cst_40 = arith.constant 5.000000e-01 : f32
    %84 = vector.broadcast %cst_40 : f32 to vector<2x1000xf32>
    %85 = arith.subf %77, %84 : vector<2x1000xf32>
    %86 = arith.select %80, %83, %85 : vector<2x1000xi1>, vector<2x1000xf32>
    %cst_41 = arith.constant 1.000000e+00 : f32
    %87 = vector.broadcast %cst_41 : f32 to vector<2x1000xf32>
    %88 = arith.cmpf olt, %78, %87 : vector<2x1000xf32>
    %cst_42 = arith.constant 5.000000e-01 : f32
    %89 = vector.broadcast %cst_42 : f32 to vector<2x1000xf32>
    %90 = arith.mulf %89, %76 : vector<2x1000xf32>
    %91 = arith.mulf %90, %76 : vector<2x1000xf32>
    %cst_43 = arith.constant 5.000000e-01 : f32
    %92 = vector.broadcast %cst_43 : f32 to vector<2x1000xf32>
    %93 = arith.subf %78, %92 : vector<2x1000xf32>
    %94 = arith.select %88, %91, %93 : vector<2x1000xi1>, vector<2x1000xf32>
    %95 = arith.addf %86, %94 : vector<2x1000xf32>
    %c0_44 = arith.constant 0 : index
    %c0_45 = arith.constant 0 : index
    %96 = vector.load %arg12[%c0_44, %c0_45] : memref<2x1000xf32, #tpu.memory_space<vmem>>, vector<2x1000xf32>
    %cst_46 = arith.constant 0.000000e+00 : f32
    %97 = vector.shape_cast %57 : vector<1x1000xi1> to vector<1x1000xi1>
    %98 = vector.broadcast %97 : vector<1x1000xi1> to vector<2x1000xi1>
    %99 = vector.broadcast %cst_46 : f32 to vector<2x1000xf32>
    %100 = arith.select %98, %95, %99 : vector<2x1000xi1>, vector<2x1000xf32>
    %101 = arith.addf %96, %100 : vector<2x1000xf32>
    %c0_47 = arith.constant 0 : index
    %c0_48 = arith.constant 0 : index
    %102 = vector.load %arg12[%c0_47, %c0_48] : memref<2x1000xf32, #tpu.memory_space<vmem>>, vector<2x1000xf32>
    tpu.vector_store %arg12[%c0_47, %c0_48], %101 {strides = array<i32>} : memref<2x1000xf32, #tpu.memory_space<vmem>>, vector<2x1000xf32>,
    %c0_49 = arith.constant 0 : index
    %c0_50 = arith.constant 0 : index
    %103 = vector.load %arg13[%c0_49, %c0_50] : memref<1x1000xf32, #tpu.memory_space<vmem>>, vector<1x1000xf32>
    %cst_51 = arith.constant 1.000000e+00 : f32
    %cst_52 = arith.constant 0.000000e+00 : f32
    %104 = vector.broadcast %cst_51 : f32 to vector<1x1000xf32>
    %105 = vector.broadcast %cst_52 : f32 to vector<1x1000xf32>
    %106 = arith.select %57, %104, %105 : vector<1x1000xi1>, vector<1x1000xf32>
    %107 = arith.addf %103, %106 : vector<1x1000xf32>
    %c0_53 = arith.constant 0 : index
    %c0_54 = arith.constant 0 : index
    %108 = vector.load %arg13[%c0_53, %c0_54] : memref<1x1000xf32, #tpu.memory_space<vmem>>, vector<1x1000xf32>
    tpu.vector_store %arg13[%c0_53, %c0_54], %107 {strides = array<i32>} : memref<1x1000xf32, #tpu.memory_space<vmem>>, vector<1x1000xf32>,
    %109 = arith.extui %5 : i1 to i32
    %c0_i32_55 = arith.constant 0 : i32
    %110 = arith.cmpi ne, %109, %c0_i32_55 : i32
    scf.if %110 {
      %c0_56 = arith.constant 0 : index
      %c0_57 = arith.constant 0 : index
      %111 = vector.load %arg11[%c0_56, %c0_57] : memref<1x1000xf32, #tpu.memory_space<vmem>>, vector<1x1000xf32>
      %112 = vector.shape_cast %111 : vector<1x1000xf32> to vector<1x1x1000xf32>
      %cst_58 = arith.constant dense<0.000000e+00> : vector<1xf32>
      %113 = vector.multi_reduction <add>, %112, %cst_58 [1, 2] : vector<1x1x1000xf32> to vector<1xf32>
      %114 = vector.shape_cast %113 : vector<1xf32> to vector<1x1x1xf32>
      %115 = vector.extract %114[0, 0, 0] : f32 from vector<1x1x1xf32>
      %116 = vector.broadcast %115 : f32 to vector<1x1xf32>
      %c0_59 = arith.constant 0 : index
      %c0_60 = arith.constant 0 : index
      %c0_61 = arith.constant 0 : index
      %117 = vector.load %arg8[%c0_59, %c0_60, %c0_61] : memref<1x1x1xf32, #tpu.memory_space<vmem>>, vector<1x1x1xf32>
      %118 = vector.shape_cast %117 : vector<1x1x1xf32> to vector<1x1xf32>
      %119 = vector.shape_cast %116 : vector<1x1xf32> to vector<1x1x1xf32>
      tpu.vector_store %arg8[%c0_59, %c0_60, %c0_61], %119 {strides = array<i32>} : memref<1x1x1xf32, #tpu.memory_space<vmem>>, vector<1x1x1xf32>,
      %c0_62 = arith.constant 0 : index
      %c0_63 = arith.constant 0 : index
      %120 = vector.load %arg12[%c0_62, %c0_63] : memref<2x1000xf32, #tpu.memory_space<vmem>>, vector<2x1000xf32>
      %121 = vector.shape_cast %120 : vector<2x1000xf32> to vector<1x2x1000xf32>
      %cst_64 = arith.constant dense<0.000000e+00> : vector<1xf32>
      %122 = vector.multi_reduction <add>, %121, %cst_64 [1, 2] : vector<1x2x1000xf32> to vector<1xf32>
      %123 = vector.shape_cast %122 : vector<1xf32> to vector<1x1x1xf32>
      %124 = vector.extract %123[0, 0, 0] : f32 from vector<1x1x1xf32>
      %125 = vector.broadcast %124 : f32 to vector<1x1xf32>
      %c0_65 = arith.constant 0 : index
      %c0_66 = arith.constant 0 : index
      %c0_67 = arith.constant 0 : index
      %126 = vector.load %arg9[%c0_65, %c0_66, %c0_67] : memref<1x1x1xf32, #tpu.memory_space<vmem>>, vector<1x1x1xf32>
      %127 = vector.shape_cast %126 : vector<1x1x1xf32> to vector<1x1xf32>
      %128 = vector.shape_cast %125 : vector<1x1xf32> to vector<1x1x1xf32>
      tpu.vector_store %arg9[%c0_65, %c0_66, %c0_67], %128 {strides = array<i32>} : memref<1x1x1xf32, #tpu.memory_space<vmem>>, vector<1x1x1xf32>,
      %c0_68 = arith.constant 0 : index
      %c0_69 = arith.constant 0 : index
      %129 = vector.load %arg13[%c0_68, %c0_69] : memref<1x1000xf32, #tpu.memory_space<vmem>>, vector<1x1000xf32>
      %130 = vector.shape_cast %129 : vector<1x1000xf32> to vector<1x1x1000xf32>
      %cst_70 = arith.constant dense<0.000000e+00> : vector<1xf32>
      %131 = vector.multi_reduction <add>, %130, %cst_70 [1, 2] : vector<1x1x1000xf32> to vector<1xf32>
      %132 = vector.shape_cast %131 : vector<1xf32> to vector<1x1x1xf32>
      %133 = vector.extract %132[0, 0, 0] : f32 from vector<1x1x1xf32>
      %134 = vector.broadcast %133 : f32 to vector<1x1xf32>
      %c0_71 = arith.constant 0 : index
      %c0_72 = arith.constant 0 : index
      %c0_73 = arith.constant 0 : index
      %135 = vector.load %arg10[%c0_71, %c0_72, %c0_73] : memref<1x1x1xf32, #tpu.memory_space<vmem>>, vector<1x1x1xf32>
      %136 = vector.shape_cast %135 : vector<1x1x1xf32> to vector<1x1xf32>
      %137 = vector.shape_cast %134 : vector<1x1xf32> to vector<1x1x1xf32>
      tpu.vector_store %arg10[%c0_71, %c0_72, %c0_73], %137 {strides = array<i32>} : memref<1x1x1xf32, #tpu.memory_space<vmem>>, vector<1x1x1xf32>,
    } else {
    }
    return
  }
  func.func @transform_0(%arg0: i32, %arg1: i32, %arg2: i32) -> (i32, i32, i32) {
    %c1_i32 = arith.constant 1 : i32
    %0 = arith.muli %arg0, %c1_i32 : i32
    %1 = arith.addi %0, %arg1 : i32
    %c0_i32 = arith.constant 0 : i32
    %2 = arith.minsi %1, %c0_i32 : i32
    %c0_i32_0 = arith.constant 0 : i32
    %c0_i32_1 = arith.constant 0 : i32
    return %arg2, %c0_i32_0, %2 : i32, i32, i32
  }
  func.func @transform_1(%arg0: i32, %arg1: i32, %arg2: i32) -> (i32, i32, i32) {
    %c1_i32 = arith.constant 1 : i32
    %0 = arith.muli %arg0, %c1_i32 : i32
    %1 = arith.addi %0, %arg1 : i32
    %c0_i32 = arith.constant 0 : i32
    %2 = arith.minsi %1, %c0_i32 : i32
    %c0_i32_0 = arith.constant 0 : i32
    %c0_i32_1 = arith.constant 0 : i32
    return %arg2, %c0_i32_0, %2 : i32, i32, i32
  }
  func.func @transform_2(%arg0: i32, %arg1: i32, %arg2: i32) -> (i32, i32, i32) {
    %c1_i32 = arith.constant 1 : i32
    %0 = arith.muli %arg0, %c1_i32 : i32
    %1 = arith.addi %0, %arg1 : i32
    %c0_i32 = arith.constant 0 : i32
    %2 = arith.minsi %1, %c0_i32 : i32
    %c0_i32_0 = arith.constant 0 : i32
    %c0_i32_1 = arith.constant 0 : i32
    return %arg2, %c0_i32_0, %2 : i32, i32, i32
  }
  func.func @transform_3(%arg0: i32, %arg1: i32, %arg2: i32) -> (i32, i32, i32) {
    %c1_i32 = arith.constant 1 : i32
    %0 = arith.muli %arg0, %c1_i32 : i32
    %1 = arith.addi %0, %arg1 : i32
    %c0_i32 = arith.constant 0 : i32
    %2 = arith.minsi %1, %c0_i32 : i32
    %c0_i32_0 = arith.constant 0 : i32
    %c0_i32_1 = arith.constant 0 : i32
    return %arg2, %c0_i32_0, %2 : i32, i32, i32
  }
  func.func @transform_4(%arg0: i32, %arg1: i32, %arg2: i32) -> (i32, i32, i32) {
    %c1_i32 = arith.constant 1 : i32
    %0 = arith.muli %arg0, %c1_i32 : i32
    %1 = arith.addi %0, %arg1 : i32
    %c0_i32 = arith.constant 0 : i32
    %2 = arith.minsi %1, %c0_i32 : i32
    %c0_i32_0 = arith.constant 0 : i32
    %c0_i32_1 = arith.constant 0 : i32
    %c0_i32_2 = arith.constant 0 : i32
    return %c0_i32_0, %c0_i32_1, %2 : i32, i32, i32
  }
  func.func @transform_5(%arg0: i32, %arg1: i32, %arg2: i32) -> (i32, i32, i32) {
    %c0_i32 = arith.constant 0 : i32
    %c0_i32_0 = arith.constant 0 : i32
    %c0_i32_1 = arith.constant 0 : i32
    return %arg0, %c0_i32, %c0_i32_0 : i32, i32, i32
  }
  func.func @transform_6(%arg0: i32, %arg1: i32, %arg2: i32) -> (i32, i32, i32) {
    %c0_i32 = arith.constant 0 : i32
    %c0_i32_0 = arith.constant 0 : i32
    %c0_i32_1 = arith.constant 0 : i32
    return %arg0, %c0_i32, %c0_i32_0 : i32, i32, i32
  }
  func.func @transform_7(%arg0: i32, %arg1: i32, %arg2: i32) -> (i32, i32, i32) {
    %c0_i32 = arith.constant 0 : i32
    %c0_i32_0 = arith.constant 0 : i32
    %c0_i32_1 = arith.constant 0 : i32
    return %arg0, %c0_i32, %c0_i32_0 : i32, i32, i32
  }
}

</mosaic_0001>

<bundles_post_ra>
// kernel: tpu_custom_call.1
= control target key start
LH: loop header
LB: loop body
LE: loop exit
PB: predicated region body
PF: predicated region fallthrough
CT: control target
= control target key end

     0   :  { %13 = vsyncpa [#allocation9], 0  ;;  %s3443_s0 = inlined_call_operand.vmem [shape: f32[2,9,1000], index: 0, kind: input, shape index: {}]   ;;  %s3444_s1 = inlined_call_operand.vmem [shape: s32[2,1,1000], index: 1, kind: input, shape index: {}]   ;;  %s3445_s2 = inlined_call_operand.vmem [shape: f32[2,4,1000], index: 2, kind: input, shape index: {}]   ;;  %s3446_s3 = inlined_call_operand.vmem [shape: f32[2,4,1000], index: 3, kind: input, shape index: {}]   ;;  %s3447_s4 = inlined_call_operand.vmem [shape: f32[1,4,1000], index: 4, kind: input, shape index: {}]   ;;  %s3448_s5 = inlined_call_operand.hbm [shape: f32[1,1,1], index: 5, kind: output, shape index: {0}]   ;;  %s3449_s6 = inlined_call_operand.hbm [shape: f32[1,1,1], index: 6, kind: output, shape index: {1}]   ;;  %s3450_s7 = inlined_call_operand.hbm [shape: f32[1,1,1], index: 7, kind: output, shape index: {2}]  }
   0x1   :  { %14 = vsyncpa [#allocation11], 0  ;;  %s2592_s24 = smov 0   ;;  %s2594_s25 = smov 0  }
   0x2   :  { %s2596_s26 = smov 0  }
   0x3 LB: > { %s2242_s27 = sadd.s32 4294967295, %s2540_s26   ;;  %s32_s28 = sadd.s32 1, %s2536_s25  ;;  %s2540_s26 = sphi %s2596_s26, %s20_s26   ;;  %s2536_s25 = sphi %s2594_s25, %s3564_s25   ;;  %s2532_s24 = sphi %s2592_s24, %s3563_s24  }
   0x4   : > { %p33_p0 = scmp.ge.s32.totalorder %s32_s28, 2  ;;  %p2246_p1 = scmp.ge.s32.totalorder %s2540_s26, 1 }
   0x5   : > { %p391_p2 = scmp.lt.s32.totalorder %s2540_s26, 3 }
   0x6   : > { %s3566_s28 = smov (%p33_p0, %s32_s28), 0 }
   0x7   : > { %p392_p3 = pnand %p2246_p1, %p391_p2 }
   0x9   : > { %395 = sbr.rel (%p392_p3) target bundleno = 538 (0x21a), region = 40 }
  0x10   : > { %p472_p4 = scmp.lt.s32.totalorder %s2532_s24, 1  ;;  %p544_p5 = scmp.eq.s32.totalorder %s2532_s24, 0 }
  0x11   : > { %p547_p6 = scmp.eq.s32.totalorder %s2532_s24, 1  ;;  %v552_v0 = vlaneseq (%p544_p5)  ;;  %vm558_vm0 = vcmask (%p544_p5), 1041408   ;;  %vm559_vm1 = vcmask (%p544_p5), 1043458   ;;  %v2542_v1 = vmov (%p544_p5), 0.0  }
  0x12   : > { %s473_s29 = scalar_select %p472_p4, %s2532_s24, 1 }
  0x13   : > { %551 = sbr.rel (!%p544_p5) target bundleno = 26 (0x1a), region = 44  ;;  %557 = vst [vmem:[#allocation3] sm:$0xff] (%p544_p5), %v2542_v1  ;;  %vm560_vm2 = vmor (%p544_p5), %vm559_vm1, %vm558_vm0  ;;  %vm561_vm3 = vcmask (%p544_p5), 1045508   ;;  %vm563_vm4 = vcmask (%p544_p5), 850950   ;;  %vm554_vm5 = vcmp.lt.s32.totalorder (%p544_p5), %v552_v0, 1000 }
  0x14   : > { %s2277_s30 = sshll.u32 %s473_s29, 7  ;;  %s2249_s8 = sshll.u32 %s473_s29, 3  ;;  %vm562_vm6 = vmor (%p544_p5), %vm561_vm3, %vm560_vm2  ;;  %556 = vst.msk [vmem:[#allocation2] sm:$0xff] (%p544_p5), %vm554_vm5, %v2542_v1 }
  0x15   : > { %s2620_s11 = scalar_lea.vmem %s3443_s0, %s2277_s30  ;;  %s2625_s14 = scalar_lea.vmem %s3444_s1, %s2249_s8  ;;  %566 = vst.msk [vmem:[#allocation4] sm:$0xff] (%p544_p5), %vm554_vm5, %v2542_v1  ;;  %vm564_vm7 = vmor (%p544_p5), %vm563_vm4, %vm562_vm6 }
  0x16   : > { %s2278_s15 = sshll.u32 %s473_s29, 5  ;;  %565 = vst.msk [vmem:[#allocation3 + $0x8] sm:$0xff] (%p544_p5), %vm564_vm7, %v2542_v1 }
  0x17   : > { %s2630_s18 = scalar_lea.vmem %s3445_s2, %s2278_s15  ;;  %s2635_s21 = scalar_lea.vmem %s3446_s3, %s2278_s15 }
  0x1a PF: > { %p2256_p7 = scmp.ne.s32.totalorder %s2532_s24, 0 }
  0x1b   : > { %v570_v2 = vld [vmem:[%s3447_s4] sm:$0xff] (!%p2256_p7)  ;;  %v571_v3 = vld [vmem:[%s3447_s4 + $0x8] sm:$0xff] (!%p2256_p7)  ;;  %v572_v4 = vld [vmem:[%s3447_s4 + $0x10] sm:$0xff] (!%p2256_p7)  ;;  %v2543_v6 = vmov (!%p2256_p7), 1983009808   ;;  %v593_v8 = vlaneseq (!%p2256_p7)  ;;  %vm623_vm8 = vcmask (!%p2256_p7), 1041408  }
  0x1c   : > { %569 = sbr.rel (%p2256_p7) target bundleno = 62 (0x3e), region = 48  ;;  %2340 = vrcp.f32 (!%p2256_p7), %v570_v2  ;;  %v573_v5 = vld [vmem:[%s3447_s4 + $0x18] sm:$0xff] (!%p2256_p7)  ;;  %v591_v7 = vunpack.c.l.s4 (!%p2256_p7), %v2543_v6  ;;  %vm624_vm9 = vcmask (!%p2256_p7), 1043458   ;;  %v635_v12 = vrot.slane (!%p2256_p7), %v570_v2, 6 }
  0x1d   : > { %2342 = vrcp.f32 (!%p2256_p7), %v571_v3  ;;  %v594_v10 = vshrl.u32 (!%p2256_p7), %v593_v8, 7  ;;  %v636_v14 = vrot.slane (!%p2256_p7), %v571_v3, 6  ;;  %vm2650_vm10 = vmor (!%p2256_p7), %vm624_vm9, %vm623_vm8  ;;  %vm626_vm11 = vcmask (!%p2256_p7), 1045508  }
  0x1e   : > { %2344 = vrcp.f32 (!%p2256_p7), %v572_v4  ;;  %v592_v9 = vunpack.c.0.s8 (!%p2256_p7), %v591_v7  ;;  %v637_v18 = vrot.slane (!%p2256_p7), %v572_v4, 6  ;;  %vm628_vm12 = vcmask (!%p2256_p7), 850950   ;;  %vm627_vm13 = vmor (!%p2256_p7), %vm626_vm11, %vm2650_vm10 }
  0x1f   : > { %2346 = vrcp.f32 (!%p2256_p7), %v573_v5  ;;  %v638_v21 = vrot.slane (!%p2256_p7), %v573_v5, 6  ;;  %vm2658_vm14 = vmor (!%p2256_p7), %vm628_vm12, %vm627_vm13 }
  0x20   : > { %v595_v11 = vsub.s32 (!%p2256_p7), %v592_v9, %v594_v10 }
  0x26   : > { %v2341_v13 = vpop.eup %2340 }
  0x27   : > { %v2343_v15 = vpop.eup %2342  ;;  %v582_v16 = vmul.f32 10.0, %v2341_v13  ;;  %2348 = vlog2.f32 %v2341_v13 }
  0x28   : > { %v2345_v19 = vpop.eup %2344  ;;  %v583_v20 = vmul.f32 10.0, %v2343_v15  ;;  %2350 = vlog2.f32 %v2343_v15 }
  0x29   : > { %v2347_v22 = vpop.eup %2346  ;;  %v596_v23 = vrot.slane %v582_v16, %v595_v11  ;;  %v584_v24 = vmul.f32 10.0, %v2345_v19  ;;  %v643_v25 = vmul.f32 %v635_v12, %v582_v16  ;;  %2352 = vlog2.f32 %v2345_v19 }
  0x2a   : > { %v603_v26 = vrot.slane %v583_v20, %v595_v11  ;;  %v585_v27 = vmul.f32 10.0, %v2347_v22  ;;  %v644_v28 = vmul.f32 %v636_v14, %v583_v20  ;;  %2354 = vlog2.f32 %v2347_v22 }
  0x2b   : > { %v611_v29 = vrot.slane %v584_v24, %v595_v11  ;;  %v657_v30 = vrot.slane %v643_v25, %v595_v11  ;;  %v645_v31 = vmul.f32 %v637_v18, %v584_v24 }
  0x2c   : > { %v604_v32 = vcombine.high %v596_v23, %v603_v26  ;;  %v618_v33 = vrot.slane %v585_v27, %v595_v11  ;;  %v664_v34 = vrot.slane %v644_v28, %v595_v11  ;;  %v646_v35 = vmul.f32 %v638_v21, %v585_v27 }
  0x2d   : > { %v672_v37 = vrot.slane %v645_v31, %v595_v11 }
  0x2e   : > { %622 = vst [vmem:[#allocation5] sm:$0xff] %v604_v32  ;;  %v619_v38 = vcombine.high %v611_v29, %v618_v33  ;;  %v665_v39 = vcombine.high %v657_v30, %v664_v34  ;;  %v679_v40 = vrot.slane %v646_v35, %v595_v11 }
  0x30   : > { %630 = vst.msk [vmem:[#allocation5 + $0x8] sm:$0xff] %vm2658_vm14, %v619_v38  ;;  %683 = vst [vmem:[#allocation6] sm:$0xff] %v665_v39  ;;  %v680_v41 = vcombine.high %v672_v37, %v679_v40 }
  0x31   : > { %v2349_v42 = vpop.eup %2348 }
  0x32   : > { %v2351_v43 = vpop.eup %2350  ;;  %684 = vst.msk [vmem:[#allocation6 + $0x8] sm:$0xff] %vm2658_vm14, %v680_v41  ;;  %v686_v44 = vmul.f32 0.6931472, %v2349_v42 }
  0x33   : > { %v2353_v45 = vpop.eup %2352  ;;  %v688_v46 = vmul.f32 0.6931472, %v2351_v43 }
  0x34   : > { %v2355_v47 = vpop.eup %2354  ;;  %v693_v48 = vmul.f32 5.0, %v686_v44  ;;  %v690_v49 = vmul.f32 0.6931472, %v2353_v45 }
  0x35   : > { %v694_v50 = vmul.f32 5.0, %v688_v46  ;;  %v692_v51 = vmul.f32 0.6931472, %v2355_v47 }
  0x36   : > { %v707_v52 = vrot.slane %v693_v48, %v595_v11  ;;  %v695_v53 = vmul.f32 5.0, %v690_v49 }
  0x37   : > { %v714_v54 = vrot.slane %v694_v50, %v595_v11  ;;  %v696_v55 = vmul.f32 5.0, %v692_v51 }
  0x38   : > { %v722_v56 = vrot.slane %v695_v53, %v595_v11 }
  0x39   : > { %v715_v57 = vcombine.high %v707_v52, %v714_v54  ;;  %v729_v58 = vrot.slane %v696_v55, %v595_v11 }
  0x3b   : > { %733 = vst [vmem:[#allocation7] sm:$0xff] %v715_v57  ;;  %v730_v59 = vcombine.high %v722_v56, %v729_v58 }
  0x3d   : > { %734 = vst.msk [vmem:[#allocation7 + $0x8] sm:$0xff] %vm2658_vm14, %v730_v59 }
  0x3e PF: > { %v2669_v60 = vld [vmem:[%s2620_s11] sm:$0xff]  ;;  %v3453_v61 = vlaneseq  ;;  %v2672_v62 = vld [vmem:[%s2620_s11 + $0x8] sm:$0xff]  ;;  %v2675_v63 = vld [vmem:[%s2620_s11 + $0x10] sm:$0xff]  ;;  %vm3452_vm15 = vcmask 1040384   ;;  %vm837_vm0 = vcmask 850944   ;;  %vm3451_vm1 = vcmask 843776  }
  0x3f   : > { %v2678_v0 = vld [vmem:[%s2620_s11 + $0x40] sm:$0x1]  ;;  %v2681_v1 = vld [vmem:[%s2620_s11 + $0x18] sm:$0xff]  ;;  %v2684_v2 = vld [vmem:[%s2620_s11 + $0x48] sm:$0x1] }
  0x40   : > { %v2687_v3 = vld [vmem:[%s2620_s11 + $0x50] sm:$0x1]  ;;  %v2690_v4 = vld [vmem:[%s2620_s11 + $0x58] sm:$0x1]  ;;  %v2693_v5 = vld [vmem:[%s2620_s11 + $0x60] sm:$0x1] }
  0x41   : > { %v2696_v6 = vld [vmem:[%s2620_s11 + $0x68] sm:$0x1]  ;;  %v2699_v7 = vld [vmem:[%s2620_s11 + $0x20] sm:$0xff]  ;;  %v781_v8 = vsel %vm3452_vm15, %v2678_v0, -inf  ;;  %v789_v9 = vsel %vm3452_vm15, %v2684_v2, -inf  ;;  %v2709_v11 = vld [vmem:[%s2620_s11 + $0x38] sm:$0xff] }
  0x42   : > { %v2706_v10 = vld [vmem:[%s2620_s11 + $0x28] sm:$0xff]  ;;  %v2712_v12 = vld [vmem:[%s2620_s11 + $0x70] sm:$0x1]  ;;  %v782_v13 = vmax.f32 %v2669_v60, %v781_v8  ;;  %v790_v14 = vmax.f32 %v2672_v62, %v789_v9  ;;  %v797_v15 = vsel %vm3452_vm15, %v2687_v3, -inf  ;;  %v2719_v16 = vshrl.u32 %v3453_v61, 7 }
  0x43   : > { %v798_v17 = vmax.f32 %v2675_v63, %v797_v15  ;;  %v805_v18 = vsel %vm3452_vm15, %v2690_v4, -inf  ;;  %v813_v19 = vsel %vm3452_vm15, %v2693_v5, -inf  ;;  %v821_v20 = vsel %vm3452_vm15, %v2696_v6, -inf  ;;  %v2729_v21 = vld [vmem:[%s2620_s11 + $0x30] sm:$0xff]  ;;  %v2732_v22 = vld [vmem:[%s2620_s11 + $0x78] sm:$0x1] }
  0x44   : > { %v783_v23 = vrot.slane %v782_v13, 4  ;;  %v791_v24 = vrot.slane %v790_v14, 4  ;;  %v806_v25 = vmax.f32 %v2681_v1, %v805_v18  ;;  %v814_v26 = vmax.f32 %v2699_v7, %v813_v19 }
  0x45   : > { %v799_v27 = vrot.slane %v798_v17, 4  ;;  %v822_v28 = vmax.f32 %v2706_v10, %v821_v20  ;;  %v829_v29 = vsel %vm3452_vm15, %v2712_v12, -inf  ;;  %v838_v30 = vsel %vm837_vm0, %v2709_v11, -inf }
  0x46   : > { %v784_v31 = vmax.f32 %v782_v13, %v783_v23  ;;  %v792_v32 = vmax.f32 %v790_v14, %v791_v24  ;;  %v807_v33 = vrot.slane %v806_v25, 4  ;;  %v815_v34 = vrot.slane %v814_v26, 4 }
  0x47   : > { %v800_v35 = vmax.f32 %v798_v17, %v799_v27  ;;  %v823_v36 = vrot.slane %v822_v28, 4  ;;  %v830_v37 = vmax.f32 %v2729_v21, %v829_v29  ;;  %v840_v38 = vsel %vm3451_vm1, %v2732_v22, -inf }
  0x48   : > { %v785_v39 = vrot.slane %v784_v31, 2  ;;  %v793_v40 = vrot.slane %v792_v32, 2  ;;  %v808_v41 = vmax.f32 %v806_v25, %v807_v33  ;;  %v816_v42 = vmax.f32 %v814_v26, %v815_v34 }
  0x49   : > { %v801_v43 = vrot.slane %v800_v35, 2  ;;  %v824_v44 = vmax.f32 %v822_v28, %v823_v36  ;;  %v831_v45 = vrot.slane %v830_v37, 4  ;;  %v841_v46 = vmax.f32 %v838_v30, %v840_v38 }
  0x4a   : > { %v786_v47 = vmax.f32 %v784_v31, %v785_v39  ;;  %v794_v48 = vmax.f32 %v792_v32, %v793_v40  ;;  %v809_v49 = vrot.slane %v808_v41, 2  ;;  %v817_v50 = vrot.slane %v816_v42, 2 }
  0x4b   : > { %v802_v51 = vmax.f32 %v800_v35, %v801_v43  ;;  %v825_v52 = vrot.slane %v824_v44, 2  ;;  %v832_v53 = vmax.f32 %v830_v37, %v831_v45  ;;  %v842_v54 = vrot.slane %v841_v46, 4 }
  0x4c   : > { %v787_v55 = vrot.slane %v786_v47, 1  ;;  %v795_v56 = vrot.slane %v794_v48, 1  ;;  %v810_v57 = vmax.f32 %v808_v41, %v809_v49  ;;  %v818_v58 = vmax.f32 %v816_v42, %v817_v50 }
  0x4d   : > { %v803_v59 = vrot.slane %v802_v51, 1  ;;  %v826_v8 = vmax.f32 %v824_v44, %v825_v52  ;;  %v833_v9 = vrot.slane %v832_v53, 2  ;;  %v843_v13 = vmax.f32 %v841_v46, %v842_v54 }
  0x4e   : > { %v788_v14 = vmax.f32 %v786_v47, %v787_v55  ;;  %v796_v15 = vmax.f32 %v794_v48, %v795_v56  ;;  %v811_v17 = vrot.slane %v810_v57, 1  ;;  %v819_v18 = vrot.slane %v818_v58, 1 }
  0x4f   : > { %v804_v19 = vmax.f32 %v802_v51, %v803_v59  ;;  %v827_v20 = vrot.slane %v826_v8, 1  ;;  %v834_v23 = vmax.f32 %v832_v53, %v833_v9  ;;  %v844_v24 = vrot.slane %v843_v13, 2 }
  0x50   : > { %v812_v25 = vmax.f32 %v810_v57, %v811_v17  ;;  %v820_v26 = vmax.f32 %v818_v58, %v819_v18  ;;  %v2745_v27 = vsub.f32 %v2669_v60, %v788_v14  ;;  %v2544_v28 = vmov 1966171168  }
  0x51   : > { %v2747_v29 = vunpack.c.l.s4 %v2544_v28  ;;  %v828_v30 = vmax.f32 %v826_v8, %v827_v20  ;;  %v835_v31 = vrot.slane %v834_v23, 1  ;;  %v845_v32 = vmax.f32 %v843_v13, %v844_v24 }
  0x52   : > { %v2750_v33 = vsub.f32 %v2672_v62, %v796_v15  ;;  %v2753_v34 = vsub.f32 %v2675_v63, %v804_v19  ;;  %v2756_v35 = vsub.f32 %v2681_v1, %v812_v25  ;;  %v2759_v36 = vsub.f32 %v2699_v7, %v820_v26 }
  0x53   : > { %v2762_v60 = vsub.f32 %v2678_v0, %v788_v14  ;;  %v836_v37 = vmax.f32 %v834_v23, %v835_v31  ;;  %v846_v38 = vrot.slane %v845_v32, 1  ;;  %v2765_v39 = vsub.f32 %v2706_v10, %v828_v30 }
  0x54   : > { %v2768_v62 = vsub.f32 %v2684_v2, %v796_v15  ;;  %v2771_v63 = vsub.f32 %v2687_v3, %v804_v19  ;;  %v2774_v1 = vsub.f32 %v2690_v4, %v812_v25  ;;  %v2777_v7 = vsub.f32 %v2693_v5, %v820_v26 }
  0x55   : > { %v864_v0 = vmul.f32 1.442695, %v2745_v27  ;;  %v847_v40 = vmax.f32 %v845_v32, %v846_v38  ;;  %v2781_v41 = vsub.f32 %v2729_v21, %v836_v37  ;;  %v2784_v10 = vsub.f32 %v2696_v6, %v828_v30  ;;  %v2798_v6 = vld [vmem:[%s2625_s14] sm:$0xff] }
  0x56   : > { %v866_v2 = vmul.f32 1.442695, %v2750_v33  ;;  %v868_v3 = vmul.f32 1.442695, %v2753_v34  ;;  %v870_v4 = vmul.f32 1.442695, %v2756_v35  ;;  %v2794_v43 = vsub.f32 %v2712_v12, %v836_v37 }
  0x57   : > { %2358 = vpow2.f32 %v864_v0  ;;  %v872_v42 = vmul.f32 1.442695, %v2759_v36  ;;  %v2791_v5 = vsub.f32 %v2709_v11, %v847_v40  ;;  %v874_v21 = vmul.f32 1.442695, %v2765_v39 }
  0x58   : > { %2360 = vpow2.f32 %v866_v2  ;;  %v2801_v44 = vsub.f32 %v2732_v22, %v847_v40  ;;  %v876_v45 = vmul.f32 1.442695, %v2781_v41  ;;  %v1166_v46 = vunpack.c.0.s8 %v2747_v29 }
  0x59   : > { %2362 = vpow2.f32 %v868_v3  ;;  %v878_v11 = vmul.f32 1.442695, %v2791_v5  ;;  %v880_v47 = vmul.f32 1.442695, %v2762_v60  ;;  %v882_v12 = vmul.f32 1.442695, %v2768_v62 }
  0x5a   : > { %2364 = vpow2.f32 %v870_v4  ;;  %v884_v48 = vmul.f32 1.442695, %v2771_v63  ;;  %v886_v49 = vmul.f32 1.442695, %v2774_v1  ;;  %v888_v22 = vmul.f32 1.442695, %v2777_v7 }
  0x5b   : > { %2366 = vpow2.f32 %v872_v42  ;;  %v890_v50 = vmul.f32 1.442695, %v2784_v10  ;;  %v892_v51 = vmul.f32 1.442695, %v2794_v43  ;;  %v2814_v52 = vsub.s32 0, %v2719_v16 }
  0x5c   : > { %2368 = vpow2.f32 %v874_v21  ;;  %v2817_v53 = vsub.s32 1, %v2719_v16  ;;  %v2820_v54 = vsub.s32 2, %v2719_v16  ;;  %v2823_v55 = vsub.s32 3, %v2719_v16 }
  0x5d   : > { %2370 = vpow2.f32 %v876_v45  ;;  %v983_v56 = vrot.slane %v2798_v6, %v2814_v52  ;;  %v2828_v57 = vsub.s32 4, %v2719_v16  ;;  %v2831_v58 = vsub.s32 5, %v2719_v16 }
  0x5e   : > { %3468 = vst [vmem:[#allocation15_spill] sm:$0xff] %v2820_v54  ;;  %3469 = vst [vmem:[#allocation16_spill] sm:$0xff] %v2823_v55  ;;  %2372 = vpow2.f32 %v878_v11  ;;  %v987_v59 = vrot.slane %v2798_v6, %v2817_v53  ;;  %v991_v8 = vrot.slane %v2798_v6, %v2820_v54  ;;  %v995_v9 = vrot.slane %v2798_v6, %v2823_v55 }
  0x5f   : > { %3470 = vst [vmem:[#allocation17_spill] sm:$0xff] %v2828_v57  ;;  %2374 = vpow2.f32 %v880_v47  ;;  %v999_v13 = vrot.slane %v2798_v6, %v2828_v57  ;;  %v1003_v14 = vrot.slane %v2798_v6, %v2831_v58  ;;  %v2844_v15 = vsub.s32 6, %v2719_v16 }
  0x60   : > { %2376 = vpow2.f32 %v882_v12  ;;  %v894_v18 = vmul.f32 1.442695, %v2801_v44  ;;  %v2848_v19 = vadd.s32 8, %v2719_v16  ;;  %v2851_v20 = vsub.s32 7, %v2719_v16 }
  0x61   : > { %v2359_v17 = vpop.eup %2358  ;;  %2378 = vpow2.f32 %v884_v48  ;;  %v1007_v24 = vrot.slane %v2798_v6, %v2844_v15  ;;  %vm1012_vm2 = vcmp.eq.s32.totalorder %v2719_v16, %v983_v56  ;;  %vm1013_vm3 = vcmp.eq.s32.totalorder %v2719_v16, %v987_v59 }
  0x62   : > { %v2361_v23 = vpop.eup %2360  ;;  %2380 = vpow2.f32 %v886_v49  ;;  %v2859_v26 = vrot.slane %v2798_v6, %v2851_v20  ;;  %vm1014_vm4 = vcmp.eq.s32.totalorder %v2719_v16, %v991_v8  ;;  %vm1015_vm5 = vcmp.eq.s32.totalorder %v2719_v16, %v995_v9 }
  0x63   : > { %v2363_v25 = vpop.eup %2362  ;;  %2382 = vpow2.f32 %v888_v22  ;;  %vm1016_vm6 = vcmp.eq.s32.totalorder %v2719_v16, %v999_v13  ;;  %vm1017_vm7 = vcmp.eq.s32.totalorder %v2719_v16, %v1003_v14  ;;  %vm1018_vm8 = vcmp.eq.s32.totalorder %v2719_v16, %v1007_v24 }
  0x64   : > { %v2365_v28 = vpop.eup %2364  ;;  %2384 = vpow2.f32 %v890_v50  ;;  %vm1019_vm9 = vcmp.eq.s32.totalorder %v2719_v16, %v2859_v26  ;;  %vm1020_vm10 = vcmp.eq.s32.totalorder %v2848_v19, %v983_v56  ;;  %vm1021_vm11 = vcmp.eq.s32.totalorder %v2848_v19, %v987_v59 }
  0x65   : > { %v2367_v30 = vpop.eup %2366  ;;  %2386 = vpow2.f32 %v892_v51  ;;  %vm1022_vm12 = vcmp.eq.s32.totalorder %v2848_v19, %v991_v8  ;;  %vm1023_vm13 = vcmp.eq.s32.totalorder %v2848_v19, %v995_v9  ;;  %vm1024_vm14 = vcmp.eq.s32.totalorder %v2848_v19, %v999_v13 }
  0x66   : > { %v2369_v31 = vpop.eup %2368  ;;  %2388 = vpow2.f32 %v894_v18  ;;  %vm1025_vm1 = vcmp.eq.s32.totalorder %v2848_v19, %v1003_v14  ;;  %vm1026_vm15 = vcmp.eq.s32.totalorder %v2848_v19, %v1007_v24  ;;  %v1028_v37 = vsel %vm1012_vm2, %v2745_v27, 0.0 }
  0x67   : > { %v2371_v32 = vpop.eup %2370  ;;  %v2881_v38 = vsel %vm1013_vm3, %v2750_v33, 0.0  ;;  %v2886_v40 = vsel %vm1014_vm4, %v2753_v34, 0.0  ;;  %v2891_v2 = vsel %vm1015_vm5, %v2756_v35, 0.0  ;;  %v2896_v27 = vsel %vm1016_vm6, %v2759_v36, 0.0 }
  0x68   : > { %v2373_v0 = vpop.eup %2372  ;;  %v2901_v33 = vsel %vm1017_vm7, %v2765_v39, 0.0  ;;  %v2907_v34 = vsel %vm1018_vm8, %v2781_v41, 0.0  ;;  %v2913_v35 = vsel %vm1019_vm9, %v2791_v5, 0.0  ;;  %v1036_v36 = vsel %vm1020_vm10, %v2762_v60, 0.0 }
  0x69   : > { %v2375_v3 = vpop.eup %2374  ;;  %v952_v4 = vsel %vm837_vm0, %v2373_v0, 0.0  ;;  %vm3471_vm2 = vcmask 1040384   ;;  %v1037_v21 = vsel %vm1021_vm11, %v2768_v62, 0.0  ;;  %v2925_v41 = vsel %vm1022_vm12, %v2771_v63, 0.0 }
  0x6a   : > { %v2377_v39 = vpop.eup %2376  ;;  %v896_v42 = vsel %vm3471_vm2, %v2375_v3, 0.0  ;;  %v2930_v5 = vsel %vm1023_vm13, %v2774_v1, 0.0  ;;  %vm3472_vm3 = vmmov %vm3471_vm2  ;;  %v2936_v47 = vsel %vm1024_vm14, %v2777_v7, 0.0  ;;  %v2941_v62 = vsel %vm1025_vm1, %v2784_v10, 0.0 }
  0x6b   : > { %v2379_v45 = vpop.eup %2378  ;;  %v897_v11 = vadd.f32 %v2359_v17, %v896_v42  ;;  %v904_v60 = vsel %vm3472_vm3, %v2377_v39, 0.0  ;;  %vm3473_vm4 = vmmov %vm3471_vm2  ;;  %v2947_v1 = vsel %vm1026_vm15, %v2794_v43, 0.0  ;;  %vm3480_vm9 = vcmask 843776  }
  0x6c   : > { %v2381_v63 = vpop.eup %2380  ;;  %v905_v12 = vadd.f32 %v2361_v23, %v904_v60  ;;  %v912_v48 = vsel %vm3473_vm4, %v2379_v45, 0.0  ;;  %vm3474_vm5 = vmmov %vm3471_vm2  ;;  %vm1027_vm10 = vcmp.eq.s32.totalorder %v2848_v19, %v2859_v26  ;;  %vm1383_vm4 = vcmp.gt.s32.totalorder %v2798_v6, 0 }
  0x6d   : > { %v1044_v49 = vsel %vm3474_vm5, %v1036_v36, 0.0  ;;  %v2383_v22 = vpop.eup %2382  ;;  %v898_v50 = vrot.slane %v897_v11, 4  ;;  %v913_v7 = vadd.f32 %v2363_v25, %v912_v48  ;;  %vm3475_vm6 = vmmov %vm3471_vm2 }
  0x6e   : > { %v920_v51 = vsel %vm3475_vm6, %v2381_v63, 0.0  ;;  %v2951_v56 = vadd.f32 %v1044_v49, %v1028_v37  ;;  %v2385_v10 = vpop.eup %2384  ;;  %v906_v59 = vrot.slane %v905_v12, 4  ;;  %vm3476_vm1 = vmmov %vm3471_vm2 }
  0x6f   : > { %v921_v8 = vadd.f32 %v2365_v28, %v920_v51  ;;  %v928_v9 = vsel %vm3476_vm1, %v2383_v22, 0.0  ;;  %vm3477_vm7 = vmmov %vm3476_vm1  ;;  %v2387_v14 = vpop.eup %2386  ;;  %v899_v17 = vadd.f32 %v898_v50, %v897_v11  ;;  %v914_v43 = vrot.slane %v913_v7, 4 }
  0x70   : > { %v1052_v13 = vsel %vm3477_vm7, %v1037_v21, 0.0  ;;  %v929_v18 = vadd.f32 %v2367_v30, %v928_v9  ;;  %vm3478_vm15 = vmmov %vm3476_vm1  ;;  %v2389_v24 = vpop.eup %2388  ;;  %v907_v0 = vadd.f32 %v906_v59, %v905_v12 }
  0x71   : > { %v936_v23 = vsel %vm3478_vm15, %v2385_v10, 0.0  ;;  %v922_v25 = vrot.slane %v921_v8, 4  ;;  %vm3479_vm8 = vmmov %vm3476_vm1  ;;  %v900_v36 = vrot.slane %v899_v17, 2  ;;  %v915_v39 = vadd.f32 %v914_v43, %v913_v7 }
  0x72   : > { %v937_v3 = vadd.f32 %v2369_v31, %v936_v23  ;;  %v944_v37 = vsel %vm3479_vm8, %v2387_v14, 0.0  ;;  %v930_v42 = vrot.slane %v929_v18, 4  ;;  %v908_v45 = vrot.slane %v907_v0, 2  ;;  %vm3481_vm11 = vmmov %vm3476_vm1 }
  0x73   : > { %v945_v28 = vadd.f32 %v2371_v32, %v944_v37  ;;  %v923_v60 = vadd.f32 %v922_v25, %v921_v8  ;;  %v953_v21 = vsel %vm3480_vm9, %v2389_v24, 0.0  ;;  %v901_v11 = vadd.f32 %v900_v36, %v899_v17  ;;  %vm3482_vm12 = vmmov %vm3476_vm1 }
  0x74   : > { %v938_v63 = vrot.slane %v937_v3, 4  ;;  %v916_v48 = vrot.slane %v915_v39, 2  ;;  %v931_v30 = vadd.f32 %v930_v42, %v929_v18  ;;  %v909_v22 = vadd.f32 %v908_v45, %v907_v0  ;;  %vm3483_vm13 = vmmov %vm3476_vm1 }
  0x75   : > { %v946_v49 = vrot.slane %v945_v28, 4  ;;  %v924_v50 = vrot.slane %v923_v60, 2  ;;  %v954_v51 = vadd.f32 %v953_v21, %v952_v4  ;;  %v902_v31 = vrot.slane %v901_v11, 1  ;;  %vm3484_vm14 = vmmov %vm3476_vm1 }
  0x76   : > { %v939_v12 = vadd.f32 %v938_v63, %v937_v3  ;;  %v917_v10 = vadd.f32 %v916_v48, %v915_v39  ;;  %v932_v59 = vrot.slane %v931_v30, 2  ;;  %v910_v7 = vrot.slane %v909_v22, 1  ;;  %vm3485_vm2 = vmmov %vm3476_vm1 }
  0x77   : > { %v947_v9 = vadd.f32 %v946_v49, %v945_v28  ;;  %v925_v14 = vadd.f32 %v924_v50, %v923_v60  ;;  %v955_v43 = vrot.slane %v954_v51, 4  ;;  %v903_v8 = vadd.f32 %v902_v31, %v901_v11  ;;  %vm3486_vm3 = vmmov %vm3480_vm9 }
  0x78   : > { %v940_v32 = vrot.slane %v939_v12, 2  ;;  %v918_v23 = vrot.slane %v917_v10, 1  ;;  %v933_v25 = vadd.f32 %v932_v59, %v931_v30  ;;  %v911_v17 = vadd.f32 %v910_v7, %v909_v22 }
  0x79   : > { %v948_v24 = vrot.slane %v947_v9, 2  ;;  %v926_v18 = vrot.slane %v925_v14, 1  ;;  %v956_v3 = vadd.f32 %v955_v43, %v954_v51  ;;  %2390 = vlog2.f32 %v903_v8 }
  0x7a   : > { %v941_v0 = vadd.f32 %v940_v32, %v939_v12  ;;  %v919_v4 = vadd.f32 %v918_v23, %v917_v10  ;;  %v934_v37 = vrot.slane %v933_v25, 1  ;;  %2392 = vlog2.f32 %v911_v17 }
  0x7b   : > { %v949_v36 = vadd.f32 %v948_v24, %v947_v9  ;;  %v927_v39 = vadd.f32 %v926_v18, %v925_v14  ;;  %v957_v28 = vrot.slane %v956_v3, 2  ;;  %v1046_v63 = vrot.slane %v2951_v56, 4 }
  0x7c   : > { %v942_v42 = vrot.slane %v941_v0, 1  ;;  %v935_v45 = vadd.f32 %v934_v37, %v933_v25  ;;  %2394 = vlog2.f32 %v919_v4  ;;  %v1053_v48 = vadd.f32 %v1052_v13, %v2881_v38 }
  0x7d   : > { %v950_v60 = vrot.slane %v949_v36, 1  ;;  %v958_v11 = vadd.f32 %v957_v28, %v956_v3  ;;  %2396 = vlog2.f32 %v927_v39  ;;  %v1047_v49 = vadd.f32 %v1046_v63, %v2951_v56 }
  0x7e   : > { %v943_v21 = vadd.f32 %v942_v42, %v941_v0  ;;  %2398 = vlog2.f32 %v935_v45  ;;  %v1060_v22 = vsel %vm3481_vm11, %v2925_v41, 0.0  ;;  %v1054_v12 = vrot.slane %v1053_v48, 4 }
  0x7f   : > { %v951_v30 = vadd.f32 %v950_v60, %v949_v36  ;;  %v959_v50 = vrot.slane %v958_v11, 1  ;;  %v1061_v51 = vadd.f32 %v1060_v22, %v2886_v40  ;;  %v1048_v31 = vrot.slane %v1047_v49, 2 }
  0x80   : > { %2400 = vlog2.f32 %v943_v21  ;;  %v1068_v10 = vsel %vm3482_vm12, %v2930_v5, 0.0  ;;  %v1076_v38 = vsel %vm3483_vm13, %v2936_v47, 0.0  ;;  %v1055_v59 = vadd.f32 %v1054_v12, %v1053_v48 }
  0x81   : > { %2402 = vlog2.f32 %v951_v30  ;;  %v960_v13 = vadd.f32 %v959_v50, %v958_v11  ;;  %v1062_v9 = vrot.slane %v1061_v51, 4  ;;  %v1069_v56 = vadd.f32 %v1068_v10, %v2891_v2 }
  0x82   : > { %v1049_v7 = vadd.f32 %v1048_v31, %v1047_v49  ;;  %v1077_v41 = vadd.f32 %v1076_v38, %v2896_v27  ;;  %v1084_v14 = vsel %vm3484_vm14, %v2941_v62, 0.0  ;;  %v1092_v40 = vsel %vm3485_vm2, %v2947_v1, 0.0 }
  0x83   : > { %v1043_v5 = vsel %vm1027_vm10, %v2801_v44, 0.0  ;;  %v1056_v47 = vrot.slane %v1055_v59, 2  ;;  %v1063_v32 = vadd.f32 %v1062_v9, %v1061_v51  ;;  %v1070_v43 = vrot.slane %v1069_v56, 4  ;;  %v2391_v8 = vpop.eup %2390 }
  0x84   : > { %v1050_v23 = vrot.slane %v1049_v7, 1  ;;  %v1078_v2 = vrot.slane %v1077_v41, 4  ;;  %v1085_v25 = vadd.f32 %v1084_v14, %v2901_v33  ;;  %v1093_v27 = vadd.f32 %v1092_v40, %v2907_v34  ;;  %v2393_v24 = vpop.eup %2392 }
  0x85   : > { %2404 = vlog2.f32 %v960_v13  ;;  %v1057_v62 = vadd.f32 %v1056_v47, %v1055_v59  ;;  %v1064_v17 = vrot.slane %v1063_v32, 2  ;;  %v1071_v1 = vadd.f32 %v1070_v43, %v1069_v56 }
  0x86   : > { %v2395_v18 = vpop.eup %2394  ;;  %v962_v0 = vmul.f32 0.6931472, %v2391_v8  ;;  %v964_v3 = vmul.f32 0.6931472, %v2393_v24  ;;  %v1079_v19 = vadd.f32 %v1078_v2, %v1077_v41  ;;  %v1086_v44 = vrot.slane %v1085_v25, 4 }
  0x87   : > { %v2397_v26 = vpop.eup %2396  ;;  %v1051_v4 = vadd.f32 %v1050_v23, %v1049_v7  ;;  %v1058_v37 = vrot.slane %v1057_v62, 1  ;;  %v1065_v36 = vadd.f32 %v1064_v17, %v1063_v32  ;;  %v1072_v39 = vrot.slane %v1071_v1, 2 }
  0x88   : > { %v2399_v42 = vpop.eup %2398  ;;  %v966_v28 = vmul.f32 0.6931472, %v2395_v18  ;;  %v1080_v33 = vrot.slane %v1079_v19, 2  ;;  %v1087_v45 = vadd.f32 %v1086_v44, %v1085_v25  ;;  %v1094_v34 = vrot.slane %v1093_v27, 4 }
  0x89   : > { %v968_v63 = vmul.f32 0.6931472, %v2397_v26  ;;  %v1059_v21 = vadd.f32 %v1058_v37, %v1057_v62  ;;  %v1066_v11 = vrot.slane %v1065_v36, 1  ;;  %v1073_v48 = vadd.f32 %v1072_v39, %v1071_v1 }
  0x8a   : > { %v2401_v60 = vpop.eup %2400  ;;  %v970_v49 = vmul.f32 0.6931472, %v2399_v42  ;;  %v1081_v22 = vadd.f32 %v1080_v33, %v1079_v19  ;;  %v1088_v50 = vrot.slane %v1087_v45, 2  ;;  %v1095_v12 = vadd.f32 %v1094_v34, %v1093_v27 }
  0x8b   : > { %v2403_v30 = vpop.eup %2402  ;;  %v972_v51 = vmul.f32 0.6931472, %v2401_v60  ;;  %v1067_v31 = vadd.f32 %v1066_v11, %v1065_v36  ;;  %v1074_v10 = vrot.slane %v1073_v48, 1  ;;  %v1100_v38 = vsel %vm837_vm0, %v2913_v35, 0.0 }
  0x8c   : > { %v1082_v13 = vrot.slane %v1081_v22, 1  ;;  %v1089_v59 = vadd.f32 %v1088_v50, %v1087_v45  ;;  %v1096_v9 = vrot.slane %v1095_v12, 2  ;;  %v1101_v56 = vsel %vm3486_vm3, %v1043_v5, 0.0 }
  0x8d   : > { %v1075_v7 = vadd.f32 %v1074_v10, %v1073_v48  ;;  %v1102_v41 = vadd.f32 %v1101_v56, %v1100_v38  ;;  %v1109_v14 = vsub.f32 %v1051_v4, %v962_v0  ;;  %v1110_v40 = vsub.f32 %v1059_v21, %v964_v3 }
  0x8e   : > { %v974_v47 = vmul.f32 0.6931472, %v2403_v30  ;;  %v1083_v32 = vadd.f32 %v1082_v13, %v1081_v22  ;;  %v1090_v43 = vrot.slane %v1089_v59, 1  ;;  %v1097_v8 = vadd.f32 %v1096_v9, %v1095_v12 }
  0x8f   : > { %v2405_v23 = vpop.eup %2404  ;;  %v1103_v2 = vrot.slane %v1102_v41, 4  ;;  %v1111_v25 = vsub.f32 %v1067_v31, %v966_v28  ;;  %v1112_v27 = vsub.f32 %v1075_v7, %v968_v63  ;;  %v1117_v24 = vmul.f32 1.442695, %v1109_v14 }
  0x90   : > { %v1091_v62 = vadd.f32 %v1090_v43, %v1089_v59  ;;  %v1098_v35 = vrot.slane %v1097_v8, 1  ;;  %v1113_v17 = vsub.f32 %v1083_v32, %v970_v49  ;;  %v1119_v1 = vmul.f32 1.442695, %v1110_v40 }
  0x91   : > { %v1104_v18 = vadd.f32 %v1103_v2, %v1102_v41  ;;  %2406 = vpow2.f32 %v1117_v24  ;;  %v1121_v5 = vmul.f32 1.442695, %v1111_v25  ;;  %v1123_v19 = vmul.f32 1.442695, %v1112_v27 }
  0x92   : > { %v1099_v44 = vadd.f32 %v1098_v35, %v1097_v8  ;;  %v1114_v0 = vsub.f32 %v1091_v62, %v972_v51  ;;  %2408 = vpow2.f32 %v1119_v1  ;;  %v1125_v3 = vmul.f32 1.442695, %v1113_v17 }
  0x93   : > { %v738_v26 = vand.u32 127, %v3453_v61  ;;  %v976_v4 = vmul.f32 0.6931472, %v2405_v23  ;;  %v1105_v37 = vrot.slane %v1104_v18, 2  ;;  %2410 = vpow2.f32 %v1121_v5 }
  0x94   : > { %v1115_v36 = vsub.f32 %v1099_v44, %v974_v47  ;;  %2412 = vpow2.f32 %v1123_v19  ;;  %v1127_v39 = vmul.f32 1.442695, %v1114_v0  ;;  %v2989_v42 = vsub.s32 %v1166_v46, %v2719_v16 }
  0x95   : > { %v1106_v28 = vadd.f32 %v1105_v37, %v1104_v18  ;;  %2414 = vpow2.f32 %v1125_v3  ;;  %v1219_v33 = vcombine.low %v1109_v14, %v1110_v40  ;;  %v1220_v45 = vcombine.low %v1111_v25, %v1112_v27 }
  0x96   : > { %2416 = vpow2.f32 %v1127_v39  ;;  %v1129_v34 = vmul.f32 1.442695, %v1115_v36  ;;  %vm1149_vm0 = vcmp.eq.s32.totalorder %v2798_v6, 0  ;;  %v1221_v60 = vcombine.low %v1113_v17, %v1114_v0 }
  0x97   : > { %v1107_v63 = vrot.slane %v1106_v28, 1  ;;  %v1229_v21 = vrot.slane %v1219_v33, %v2989_v42  ;;  %v1236_v11 = vrot.slane %v1220_v45, %v2989_v42  ;;  %v2545_v48 = vmov 0   ;;  %v1437_v45 = vld [vmem:[%s2635_s21] sm:$0xff] }
  0x98   : > { %2418 = vpow2.f32 %v1129_v34  ;;  %v1384_v30 = vsel %vm1383_vm4, 1, %v2545_v48  ;;  %v2996_v49 = vadd.s32 896, %v738_v26  ;;  %v2546_v22 = vmov 1000.0   ;;  %v3039_v34 = vld [vmem:[#allocation7] sm:$0xff] }
  0x99   : > { %v1108_v29 = vadd.f32 %v1107_v63, %v1106_v28  ;;  %v1251_v46 = vcombine.low %v1229_v21, %v1236_v11  ;;  %v2998_v50 = vsel %vm1149_vm0, 10.0, %v2546_v22  ;;  %v1243_v12 = vrot.slane %v1221_v60, %v2989_v42 }
  0x9a   : > { %v2547_v51 = vmov 1983009808   ;;  %v1388_v13 = vrot.slane %v1384_v30, %v2814_v52  ;;  %v1392_v6 = vrot.slane %v1384_v30, %v2817_v53  ;;  %v1396_v59 = vrot.slane %v1384_v30, %v2820_v54 }
  0x9b   : > { %v1448_v31 = vunpack.c.l.s4 %v2547_v51  ;;  %v2407_v10 = vpop.eup %2406  ;;  %v1116_v38 = vsub.f32 %v1108_v29, %v976_v4  ;;  %v3005_v7 = vrot.slane %v1251_v46, %v2989_v42  ;;  %v1400_v41 = vrot.slane %v1384_v30, %v2823_v55  ;;  %v1438_v29 = vld [vmem:[%s2635_s21 + $0x8] sm:$0xff] }
  0x9c   : > { %v2409_v9 = vpop.eup %2408  ;;  %v1133_v56 = vsub.f32 1.0, %v2407_v10  ;;  %v1404_v14 = vrot.slane %v1384_v30, %v2828_v57  ;;  %v1408_v8 = vrot.slane %v1384_v30, %v2831_v58  ;;  %v1412_v27 = vrot.slane %v1384_v30, %v2844_v15 }
  0x9d   : > { %v2411_v40 = vpop.eup %2410  ;;  %v1131_v47 = vmul.f32 1.442695, %v1116_v38  ;;  %v1134_v32 = vsub.f32 1.0, %v2409_v9  ;;  %v1222_v43 = vcombine.low %v1115_v36, %v1116_v38  ;;  %v1416_v24 = vrot.slane %v1384_v30, %v2851_v20  ;;  %v1439_v38 = vld [vmem:[%s2635_s21 + $0x10] sm:$0xff] }
  0x9e   : > { %v2413_v23 = vpop.eup %2412  ;;  %v1135_v2 = vsub.f32 1.0, %v2411_v40  ;;  %v1141_v25 = vmul.f32 %v1133_v56, %v1133_v56  ;;  %vm762_vm5 = vcmp.lt.s32.totalorder %v2996_v49, 1000  ;;  %vm3014_vm6 = vcmp.ne.s32.totalorder %v1388_v13, 0  ;;  %v1440_v56 = vld [vmem:[%s2635_s21 + $0x18] sm:$0xff] }
  0x9f   : > { %v2415_v62 = vpop.eup %2414  ;;  %2420 = vpow2.f32 %v1131_v47  ;;  %v1136_v35 = vsub.f32 1.0, %v2413_v23  ;;  %v1142_v17 = vmul.f32 %v1134_v32, %v1134_v32  ;;  %v1250_v1 = vrot.slane %v1222_v43, %v2989_v42  ;;  %v3067_v47 = vld [vmem:[#allocation7 + $0x8] sm:$0xff] }
  0xa0   : > { %vm3018_vm1 = vcmp.ne.s32.totalorder %v1392_v6, 0  ;;  %v2417_v19 = vpop.eup %2416  ;;  %v1137_v44 = vsub.f32 1.0, %v2415_v62  ;;  %v1143_v0 = vmul.f32 %v1135_v2, %v1135_v2  ;;  %vm3022_vm7 = vcmp.ne.s32.totalorder %v1396_v59, 0  ;;  %v1442_v2 = vld [vmem:[#allocation5 + $0x8] sm:$0xff] }
  0xa1   : > { %vm3026_vm15 = vcmp.ne.s32.totalorder %v1400_v41, 0  ;;  %v1138_v4 = vsub.f32 1.0, %v2417_v19  ;;  %v1144_v37 = vmul.f32 %v1136_v35, %v1136_v35  ;;  %v1160_v36 = vcombine.low %v1141_v25, %v1142_v17 }
  0xa2   : > { %v1252_v39 = vcombine.low %v1243_v12, %v1250_v1  ;;  %vm3030_vm8 = vcmp.ne.s32.totalorder %v1404_v14, 0  ;;  %vm3034_vm9 = vcmp.ne.s32.totalorder %v1408_v8, 0  ;;  %v2419_v60 = vpop.eup %2418  ;;  %v1145_v63 = vmul.f32 %v1137_v44, %v1137_v44  ;;  %v1441_v8 = vld [vmem:[#allocation5] sm:$0xff]  ;;  %v1481_v1 = vld [vmem:[#allocation6] sm:$0xff] }
  0xa3   : > { %vm3041_vm10 = vcmp.ne.s32.totalorder %v1412_v27, 0  ;;  %v3499_v21 = vmov 0  ;;  %vm3045_vm11 = vcmp.ne.s32.totalorder %v1416_v24, 0  ;;  %v1449_v46 = vunpack.c.0.s8 %v1448_v31 }
  0xa4   : > { %v3500_v21 = vsel %vm3041_vm10, 4294967295, %v3499_v21  ;;  %v1139_v30 = vsub.f32 1.0, %v2419_v60  ;;  %v1146_v22 = vmul.f32 %v1138_v4, %v1138_v4  ;;  %v1161_v12 = vcombine.low %v1143_v0, %v1144_v37  ;;  %vm3087_vm12 = vmand %vm762_vm5, %vm3045_vm11 }
  0xa5   : > { %v1170_v51 = vrot.slane %v1160_v36, %v2989_v42  ;;  %v3052_v10 = vrot.slane %v1252_v39, %v2989_v42  ;;  %v3056_v13 = vsub.s32 %v1449_v46, %v2719_v16  ;;  %2422 = vlog2.f32 %v1437_v45  ;;  %v1482_v36 = vld [vmem:[#allocation6 + $0x8] sm:$0xff] }
  0xa6   : > { %v1501_v6 = vcombine.low %v3039_v34, %v3039_v34  ;;  %v1147_v59 = vmul.f32 %v1139_v30, %v1139_v30  ;;  %v1162_v9 = vcombine.low %v1145_v63, %v1146_v22  ;;  %v1177_v31 = vrot.slane %v1161_v12, %v2989_v42 }
  0xa7   : > { %2424 = vlog2.f32 %v1438_v29  ;;  %v1453_v14 = vrot.slane %v1437_v45, %v3056_v13  ;;  %v1460_v40 = vrot.slane %v1438_v29, %v3056_v13  ;;  %v1468_v16 = vrot.slane %v1439_v38, %v3056_v13 }
  0xa8   : > { %v3070_v32 = vrot.slane %v1162_v9, %v2989_v42  ;;  %v1192_v43 = vcombine.low %v1170_v51, %v1177_v31  ;;  %v1475_v23 = vrot.slane %v1440_v56, %v3056_v13  ;;  %2426 = vlog2.f32 %v1439_v38 }
  0xa9   : > { %v1461_v25 = vcombine.low %v1453_v14, %v1460_v40  ;;  %2428 = vlog2.f32 %v1440_v56  ;;  %v1508_v27 = vrot.slane %v1501_v6, %v3056_v13  ;;  %v1515_v24 = vrot.slane %v3039_v34, %v3056_v13  ;;  %v2421_v62 = vpop.eup %2420 }
  0xaa   : > { %v3077_v35 = vrot.slane %v1192_v43, %v2989_v42  ;;  %v1476_v17 = vcombine.low %v1468_v16, %v1475_v23  ;;  %v1516_v19 = vcombine.low %v3067_v47, %v3067_v47  ;;  %v1140_v0 = vsub.f32 1.0, %v2421_v62  ;;  %v1433_v43 = vld [vmem:[%s2630_s18] sm:$0xff] }
  0xab   : > { %v3503_v4 = vmov 0  ;;  %v1479_v37 = vmul.f32 %v1461_v25, %v1441_v8  ;;  %v3094_v39 = vsel %vm3014_vm6, 1, %v2545_v48  ;;  %v3099_v45 = vsel %vm3018_vm1, 1, %v2545_v48 }
  0xac   : > { %v3504_v4 = vsel %vm3087_vm12, 4294967295, %v3503_v4  ;;  %v1480_v34 = vmul.f32 %v1476_v17, %v1442_v2  ;;  %v1523_v60 = vrot.slane %v1516_v19, %v3056_v13  ;;  %v3105_v63 = vsel %vm3022_vm7, 1, %v2545_v48 }
  0xad   : > { %3505 = vst [vmem:[#allocation18_spill] sm:$0xff] %v3504_v4  ;;  %v3110_v11 = vsel %vm3026_vm15, 1, %v2545_v48  ;;  %v1148_v29 = vmul.f32 %v1140_v0, %v1140_v0  ;;  %v1483_v46 = vsub.f32 %v1479_v37, %v1481_v1  ;;  %v3115_v30 = vsel %vm3030_vm8, 1, %v2545_v48  ;;  %v1434_v0 = vld [vmem:[%s2630_s18 + $0x8] sm:$0xff] }
  0xae   : > { %v3120_v22 = vsel %vm3034_vm9, 1, %v2545_v48  ;;  %v1484_v12 = vsub.f32 %v1480_v34, %v1482_v36  ;;  %v3125_v51 = vsel %vm3041_vm10, 1, %v2545_v48  ;;  %v3130_v38 = vsel %vm3087_vm12, 1, %v2545_v48 }
  0xaf   : > { %v2423_v9 = vpop.eup %2422  ;;  %v1163_v31 = vcombine.low %v1147_v59, %v1148_v29  ;;  %v1541_v56 = vcombine.high %v1483_v46, %v1483_v46  ;;  %v1548_v14 = vrot.slane %v1483_v46, %v3056_v13  ;;  %v1435_v59 = vld [vmem:[%s2630_s18 + $0x10] sm:$0xff]  ;;  %vm1768_vm12 = vcmask 1041408  }
  0xb0   : > { %v1486_v8 = vmul.f32 0.6931472, %v2423_v9  ;;  %v1556_v23 = vcombine.high %v1484_v12, %v1484_v12  ;;  %v1563_v48 = vrot.slane %v1484_v12, %v3056_v13  ;;  %v1436_v9 = vld [vmem:[%s2630_s18 + $0x18] sm:$0xff]  ;;  %vm1773_vm10 = vcmask 850950  }
  0xb1   : > { %v2425_v16 = vpop.eup %2424  ;;  %v1191_v25 = vrot.slane %v1163_v31, %v2989_v42  ;;  %v1555_v17 = vrot.slane %v1541_v56, %v3056_v13  ;;  %v1575_v1 = vsub.f32 %v1433_v43, %v1548_v14 }
  0xb2   : > { %v1488_v62 = vmul.f32 0.6931472, %v2425_v16  ;;  %v2427_v19 = vpop.eup %2426  ;;  %v1493_v37 = vmul.f32 5.0, %v1486_v8  ;;  %v1570_v36 = vrot.slane %v1556_v23, %v3056_v13  ;;  %v1577_v34 = vsub.f32 %v1435_v59, %v1563_v48 }
  0xb3   : > { %v2429_v46 = vpop.eup %2428  ;;  %v1193_v12 = vcombine.low %v3070_v32, %v1191_v25  ;;  %v1490_v2 = vmul.f32 0.6931472, %v2427_v19  ;;  %v1576_v40 = vsub.f32 %v1434_v0, %v1555_v17  ;;  %v1583_v14 = vand.u32 2147483647, %v1575_v1 }
  0xb4   : > { %v1494_v31 = vmul.f32 5.0, %v1488_v62  ;;  %v1492_v16 = vmul.f32 0.6931472, %v2429_v46  ;;  %v1535_v6 = vadd.f32 %v1508_v27, %v1493_v37  ;;  %v1578_v56 = vsub.f32 %v1436_v9, %v1570_v36  ;;  %v3540_v5 = vld [vmem:[#allocation18_spill] sm:$0xff] }
  0xb5   : > { %v1207_v61 = vrot.slane %v1193_v12, %v2989_v42  ;;  %v1495_v8 = vmul.f32 5.0, %v1490_v2  ;;  %v1584_v23 = vand.u32 2147483647, %v1576_v40  ;;  %v1585_v29 = vand.u32 2147483647, %v1577_v34 }
  0xb6   : > { %v1536_v41 = vadd.f32 %v1515_v24, %v1494_v31  ;;  %v1496_v48 = vmul.f32 5.0, %v1492_v16  ;;  %v3151_v44 = vsub.f32 %v1433_v43, %v1535_v6  ;;  %v1586_v4 = vand.u32 2147483647, %v1578_v56 }
  0xb7   : > { %v1208_v32 = vcombine.low %v3077_v35, %v1207_v61  ;;  %v1537_v25 = vadd.f32 %v1523_v60, %v1495_v8  ;;  %vm3154_vm13 = vcmp.lt.f32.partialorder %v1583_v14, 1.0  ;;  %v3508_v27 = vrot.slane %v3067_v47, %v3056_v13 }
  0xb8   : > { %v1580_v19 = vsub.f32 %v1434_v0, %v1536_v41  ;;  %v1587_v24 = vand.u32 2147483647, %v3151_v44  ;;  %vm3162_vm14 = vcmp.lt.f32.partialorder %v1584_v23, 1.0  ;;  %vm3166_vm2 = vcmp.lt.f32.partialorder %v1585_v29, 1.0 }
  0xb9   : > { %v1538_v17 = vadd.f32 %v3508_v27, %v1496_v48  ;;  %v1210_v61 = vmul.f32 %v1208_v32, %v2998_v50  ;;  %v1581_v41 = vsub.f32 %v1435_v59, %v1537_v25  ;;  %vm3171_vm3 = vcmp.lt.f32.partialorder %v1586_v4, 1.0 }
  0xba   : > { %v1588_v35 = vand.u32 2147483647, %v1580_v19  ;;  %v1595_v43 = vmul.f32 0.5, %v1575_v1  ;;  %v1596_v0 = vmul.f32 0.5, %v1576_v40  ;;  %v1597_v37 = vmul.f32 0.5, %v1577_v34 }
  0xbb   : > { %v1582_v47 = vsub.f32 %v1436_v9, %v1538_v17  ;;  %v3515_v36 = vcombine.low %v3005_v7, %v3052_v10  ;;  %v1589_v12 = vand.u32 2147483647, %v1581_v41  ;;  %v1598_v31 = vmul.f32 0.5, %v1578_v56 }
  0xbc   : > { %v3178_v16 = vadd.f32 -0.5, %v1583_v14  ;;  %v3180_v50 = vmul.f32 %v1595_v43, %v1575_v1  ;;  %v3182_v59 = vmul.f32 %v1596_v0, %v1576_v40  ;;  %v3184_v48 = vmul.f32 %v1597_v37, %v1577_v34 }
  0xbd   : > { %v1269_v46 = vmul.f32 %v3515_v36, %v1210_v61  ;;  %v1590_v8 = vand.u32 2147483647, %v1582_v47  ;;  %v1602_v34 = vmul.f32 %v1598_v31, %v1578_v56  ;;  %v2258_v61 = vadd.f32 -0.5, %v1584_v23 }
  0xbe   : > { %v2259_v37 = vadd.f32 -0.5, %v1585_v29  ;;  %v2260_v36 = vadd.f32 -0.5, %v1586_v4  ;;  %v3516_v56 = vlaneseq  ;;  %v3517_v23 = vmov 0 }
  0xbf   : > { %v1274_v9 = vrot.slane %v1269_v46, %v2814_v52  ;;  %v1278_v32 = vrot.slane %v1269_v46, %v2817_v53  ;;  %v1282_v25 = vrot.slane %v1269_v46, %v2820_v54  ;;  %v1286_v7 = vrot.slane %v1269_v46, %v2823_v55 }
  0xc0   : > { %v1290_v10 = vrot.slane %v1269_v46, %v2828_v57  ;;  %v1294_v14 = vrot.slane %v1269_v46, %v2831_v58  ;;  %v1298_v27 = vrot.slane %v1269_v46, %v2844_v15  ;;  %v1302_v1 = vrot.slane %v1269_v46, %v2851_v20 }
  0xc1   : > { %v1327_v40 = vcombine.low %v1274_v9, %v1278_v32  ;;  %v1328_v17 = vcombine.low %v1282_v25, %v1286_v7  ;;  %v1607_v46 = vsel %vm3154_vm13, %v3180_v50, %v3178_v16  ;;  %vm3204_vm0 = vcmp.lt.s32.totalorder %v3516_v56, 1000  ;;  %v1776_v16 = vld [vmem:[#allocation4] sm:$0xff] }
  0xc2   : > { %v1318_v43 = vsel %vm762_vm5, %v1302_v1, 0.0  ;;  %v1329_v0 = vcombine.low %v1290_v10, %v1294_v14  ;;  %v3518_v23 = vsel %vm3204_vm0, 4294967295, %v3517_v23  ;;  %v1608_v49 = vsel %vm3162_vm14, %v3182_v59, %v2258_v61 }
  0xc3   : > { %v1330_v54 = vcombine.low %v1298_v27, %v1318_v43  ;;  %v1337_v55 = vrot.slane %v1327_v40, %v2989_v42  ;;  %v1344_v57 = vrot.slane %v1328_v17, %v2989_v42  ;;  %v1609_v4 = vsel %vm3166_vm2, %v3184_v48, %v2259_v37  ;;  %v1151_v17 = vld [vmem:[#allocation2] sm:$0xff] }
  0xc4   : > { %v1351_v9 = vrot.slane %v1329_v0, %v2989_v42  ;;  %v1610_v29 = vsel %vm3171_vm3, %v1602_v34, %v2260_v36  ;;  %vm3217_vm4 = vcmp.lt.f32.partialorder %v1587_v24, 1.0  ;;  %vm3221_vm5 = vcmp.lt.f32.partialorder %v1588_v35, 1.0 }
  0xc5   : > { %v1358_v62 = vrot.slane %v1330_v54, %v2989_v42  ;;  %v1359_v31 = vcombine.low %v1337_v55, %v1344_v57  ;;  %vm3225_vm11 = vcmp.lt.f32.partialorder %v1589_v12, 1.0  ;;  %vm3229_vm13 = vcmp.lt.f32.partialorder %v1590_v8, 1.0 }
  0xc6   : > { %v1615_v60 = vmul.f32 0.5, %v3151_v44  ;;  %v1616_v54 = vmul.f32 0.5, %v1580_v19  ;;  %v1617_v59 = vmul.f32 0.5, %v1581_v41  ;;  %v1618_v48 = vmul.f32 0.5, %v1582_v47 }
  0xc7   : > { %v1360_v55 = vcombine.low %v1351_v9, %v1358_v62  ;;  %v1367_v57 = vrot.slane %v1359_v31, %v2989_v42  ;;  %v2261_v7 = vadd.f32 -0.5, %v1587_v24  ;;  %v2262_v10 = vadd.f32 -0.5, %v1588_v35 }
  0xc8   : > { %v1619_v32 = vmul.f32 %v1615_v60, %v3151_v44  ;;  %v1620_v25 = vmul.f32 %v1616_v54, %v1580_v19  ;;  %v1621_v27 = vmul.f32 %v1617_v59, %v1581_v41  ;;  %v1622_v1 = vmul.f32 %v1618_v48, %v1582_v47 }
  0xc9   : > { %v1374_v14 = vrot.slane %v1360_v55, %v2989_v42  ;;  %v2263_v40 = vadd.f32 -0.5, %v1589_v12  ;;  %v2264_v34 = vadd.f32 -0.5, %v1590_v8  ;;  %v1680_v0 = vrot.slane %v3115_v30, %v2814_v52 }
  0xca   : > { %v1627_v61 = vsel %vm3217_vm4, %v1619_v32, %v2261_v7  ;;  %v1628_v43 = vsel %vm3221_vm5, %v1620_v25, %v2262_v10  ;;  %v1684_v12 = vrot.slane %v3120_v22, %v2814_v52  ;;  %v1688_v8 = vrot.slane %v3125_v51, %v2814_v52 }
  0xcb   : > { %v1375_v44 = vcombine.low %v1367_v57, %v1374_v14  ;;  %v1629_v19 = vsel %vm3225_vm11, %v1621_v27, %v2263_v40  ;;  %v2265_v24 = vrot.slane %v1627_v61, 10  ;;  %v2266_v35 = vrot.slane %v1628_v43, 10  ;;  %v1651_v40 = vld [vmem:[#allocation3] sm:$0xff] }
  0xcc   : > { %v1630_v41 = vsel %vm3229_vm13, %v1622_v1, %v2264_v34  ;;  %v2267_v47 = vrot.slane %v1629_v19, 10  ;;  %v1692_v62 = vrot.slane %v3130_v38, %v2814_v52  ;;  %v3527_v31 = vrot.slane %v3094_v39, %v2814_v52 }
  0xcd   : > { %v1377_v37 = vadd.f32 %v1375_v44, %v1151_v17  ;;  %v2268_v36 = vrot.slane %v1630_v41, 10  ;;  %v1647_v9 = vadd.f32 %v2265_v24, %v1607_v46  ;;  %v1648_v30 = vadd.f32 %v2266_v35, %v1608_v49  ;;  %v1652_v17 = vld [vmem:[#allocation3 + $0x8] sm:$0xff] }
  0xce   : > { %v1649_v56 = vadd.f32 %v2267_v47, %v1609_v4  ;;  %vm3256_vm14 = vcmp.eq.s32.totalorder %v3527_v31, 1  ;;  %v3530_v22 = vrot.slane %v3099_v45, %v2814_v52  ;;  %v3531_v46 = vrot.slane %v3105_v63, %v2814_v52  ;;  %v3543_v49 = vld [vmem:[#allocation15_spill] sm:$0xff] (%p547_p6) }
  0xcf   : > { %1382 = vst.msk [vmem:[#allocation2] sm:$0xff] %vm3204_vm0, %v1377_v37  ;;  %v1650_v51 = vadd.f32 %v2268_v36, %v1610_v29  ;;  %v3534_v39 = vrot.slane %v3110_v11, %v2814_v52  ;;  %vm3275_vm5 = vcmp.eq.s32.totalorder %v1680_v0, 1  ;;  %vm1698_vm11 = vcmp.eq.s32.totalorder %v1684_v12, 1 }
  0xd0   : > { %vm1694_vm2 = vcmp.eq.s32.totalorder %v3530_v22, 1  ;;  %vm3268_vm3 = vcmp.eq.s32.totalorder %v3531_v46, 1  ;;  %vm3279_vm13 = vcmp.eq.s32.totalorder %v1688_v8, 1  ;;  %vm1700_vm0 = vcmp.eq.s32.totalorder %v1692_v62, 1 }
  0xd1   : > { %vm1696_vm4 = vcmp.eq.s32.totalorder %v3534_v39, 1  ;;  %v1705_v4 = vcombine.high %v1647_v9, %v1647_v9  ;;  %v1706_v63 = vcombine.high %v1648_v30, %v1648_v30  ;;  %v1707_v29 = vcombine.high %v1649_v56, %v1649_v56 }
  0xd2   : > { %v1708_v50 = vcombine.high %v1650_v51, %v1650_v51  ;;  %v1713_v2 = vsel %vm3256_vm14, %v1647_v9, 0.0  ;;  %v1715_v11 = vsel %vm3268_vm3, %v1648_v30, 0.0  ;;  %v1717_v60 = vsel %vm3275_vm5, %v1649_v56, 0.0 }
  0xd3   : > { %v1714_v6 = vsel %vm1694_vm2, %v1705_v4, 0.0  ;;  %v1719_v54 = vsel %vm3279_vm13, %v1650_v51, 0.0  ;;  %v1716_v55 = vsel %vm1696_vm4, %v1706_v63, 0.0  ;;  %v1718_v57 = vsel %vm1698_vm11, %v1707_v29, 0.0  ;;  %v3544_v4 = vld [vmem:[#allocation16_spill] sm:$0xff] (%p547_p6) }
  0xd4   : > { %v1720_v59 = vsel %vm1700_vm0, %v1708_v50, 0.0  ;;  %v1729_v48 = vcombine.low %v1713_v2, %v1714_v6  ;;  %v1730_v32 = vcombine.low %v1715_v11, %v1716_v55  ;;  %v1746_v25 = vcombine.low %v1717_v60, %v1718_v57 }
  0xd5   : > { %v1747_v7 = vcombine.low %v1719_v54, %v1720_v59  ;;  %vm1769_vm14 = vcmask 1043458   ;;  %vm1771_vm2 = vcmask 1045508   ;;  %v2548_v34 = vmov 0.0  }
  0xd6   : > { %v1737_v10 = vrot.slane %v1729_v48, %v3056_v13  ;;  %v1744_v14 = vrot.slane %v1730_v32, %v3056_v13  ;;  %v1754_v27 = vrot.slane %v1746_v25, %v3056_v13  ;;  %vm1770_vm3 = vmor %vm1769_vm14, %vm1768_vm12  ;;  %v1777_v61 = vsel %vm3014_vm6, 1.0, %v2548_v34  ;;  %v1847_v29 = vld [vmem:[#allocation2] sm:$0xff] (%p547_p6) }
  0xd7   : > { %v1761_v1 = vrot.slane %v1747_v7, %v3056_v13  ;;  %vm1772_vm0 = vmor %vm1771_vm2, %vm1770_vm3  ;;  %v1778_v43 = vsel %vm3018_vm1, 1.0, %v2548_v34  ;;  %v1779_v0 = vsel %vm3022_vm7, 1.0, %v2548_v34  ;;  %v1780_v44 = vsel %vm3026_vm15, 1.0, %v2548_v34 }
  0xd8   : > { %v1745_v19 = vcombine.low %v1737_v10, %v1744_v14  ;;  %v1781_v35 = vsel %vm3030_vm8, 1.0, %v2548_v34  ;;  %v1782_v41 = vsel %vm3034_vm9, 1.0, %v2548_v34  ;;  %vm1774_vm4 = vmor %vm1773_vm10, %vm1772_vm0  ;;  %vm3539_vm6 = vnez %v3500_v21 }
  0xd9   : > { %v1762_v24 = vcombine.low %v1754_v27, %v1761_v1  ;;  %v1783_v18 = vsel %vm3539_vm6, 1.0, %v2548_v34  ;;  %vm3541_vm1 = vnez %v3540_v5  ;;  %v1793_v47 = vcombine.low %v1777_v61, %v1778_v43 }
  0xda   : > { %v1784_v3 = vsel %vm3541_vm1, 1.0, %v2548_v34  ;;  %v1794_v12 = vcombine.low %v1779_v0, %v1780_v44  ;;  %v1765_v26 = vadd.f32 %v1745_v19, %v1651_v40  ;;  %v1795_v37 = vcombine.low %v1781_v35, %v1782_v41 }
  0xdb   : > { %v1766_v8 = vadd.f32 %v1762_v24, %v1652_v17  ;;  %v1796_v36 = vcombine.low %v1783_v18, %v1784_v3  ;;  %v1803_v28 = vrot.slane %v1793_v47, %v2989_v42  ;;  %vm3542_vm7 = vnez %v3518_v23 }
  0xdc   : > { %v1810_v9 = vrot.slane %v1794_v12, %v2989_v42  ;;  %1767 = vst [vmem:[#allocation3] sm:$0xff] %v1765_v26  ;;  %v1817_v33 = vrot.slane %v1795_v37, %v2989_v42  ;;  %vm3546_vm15 = vcmask (%p547_p6), 1040384   ;;  %v1852_v57 = vrot.slane (%p547_p6), %v1847_v29, %v2814_v52 }
  0xdd   : > { %1775 = vst.msk [vmem:[#allocation3 + $0x8] sm:$0xff] %vm1774_vm4, %v1766_v8  ;;  %v1824_v21 = vrot.slane %v1796_v36, %v2989_v42  ;;  %vm3547_vm8 = vmmov (%p547_p6), %vm3546_vm15  ;;  %v1856_v59 = vrot.slane (%p547_p6), %v1847_v29, %v2817_v53  ;;  %v1860_v48 = vrot.slane (%p547_p6), %v1847_v29, %v3543_v49  ;;  %v1864_v25 = vrot.slane (%p547_p6), %v1847_v29, %v3544_v4 }
  0xde   : > { %v1825_v30 = vcombine.low %v1803_v28, %v1810_v9  ;;  %vm3548_vm9 = vmmov (%p547_p6), %vm3547_vm8  ;;  %v1872_v0 = vrot.slane (%p547_p6), %v1847_v29, %v2831_v58  ;;  %v1876_v18 = vrot.slane (%p547_p6), %v1847_v29, %v2844_v15  ;;  %vm3558_vm6 = vcmask (%p547_p6), 843776  }
  0xdf   : > { %v1826_v56 = vcombine.low %v1817_v33, %v1824_v21  ;;  %vm3549_vm10 = vmmov (%p547_p6), %vm3547_vm8  ;;  %v1880_v36 = vrot.slane (%p547_p6), %v1847_v29, %v2851_v20 }
  0xe0   : > { %v1833_v62 = vrot.slane %v1825_v30, %v2989_v42  ;;  %vm3550_vm5 = vmmov (%p547_p6), %vm3547_vm8 }
  0xe1   : > { %v1840_v31 = vrot.slane %v1826_v56, %v2989_v42  ;;  %1846 = sbr.rel (!%p547_p6) target bundleno = 467 (0x1d3), region = 52  ;;  %v3545_v42 = vld [vmem:[#allocation17_spill] sm:$0xff] (%p547_p6)  ;;  %vm3551_vm11 = vmmov (%p547_p6), %vm3550_vm5 }
  0xe2   : > { %v1868_v10 = vrot.slane (%p547_p6), %v1847_v29, %v3545_v42  ;;  %v1889_v14 = vsel (%p547_p6), %vm3551_vm11, %v1852_v57, 0.0  ;;  %vm3552_vm13 = vmmov (%p547_p6), %vm3550_vm5 }
  0xe3   : > { %v1841_v22 = vcombine.low %v1833_v62, %v1840_v31  ;;  %v1890_v27 = vsel (%p547_p6), %vm3552_vm13, %v1856_v59, 0.0  ;;  %v1916_v1 = vld [vmem:[#allocation3] sm:$0xff] (%p547_p6)  ;;  %vm3553_vm14 = vmmov (%p547_p6), %vm3550_vm5 }
  0xe4   : > { %v1917_v34 = vld [vmem:[#allocation3 + $0x8] sm:$0xff] (%p547_p6)  ;;  %vm3554_vm2 = vmmov (%p547_p6), %vm3550_vm5  ;;  %v1920_v35 = vcombine.high (%p547_p6), %v1916_v1, %v1916_v1  ;;  %v1927_v41 = vrot.slane (%p547_p6), %v1916_v1, %v3056_v13 }
  0xe5   : > { %v1843_v51 = vadd.f32 %v1841_v22, %v1776_v16  ;;  %vm3555_vm3 = vmmov (%p547_p6), %vm3554_vm2  ;;  %v1937_v3 = vcombine.high (%p547_p6), %v1917_v34, %v1917_v34  ;;  %v1944_v47 = vrot.slane (%p547_p6), %v1917_v34, %v3056_v13 }
  0xe6   : > { %vm3556_vm0 = vmmov (%p547_p6), %vm3554_vm2  ;;  %v1934_v8 = vrot.slane (%p547_p6), %v1920_v35, %v3056_v13  ;;  %v1935_v37 = vcombine.high (%p547_p6), %v1927_v41, %v1927_v41  ;;  %v1962_v9 = vsel (%p547_p6), %vm1768_vm12, %v1927_v41, 0.0 }
  0xe7   : > { %1844 = vst.msk [vmem:[#allocation4] sm:$0xff] %vm3542_vm7, %v1843_v51  ;;  %v1894_v44 = vsel (%p547_p6), %vm3556_vm0, %v1864_v25, 0.0  ;;  %vm3557_vm4 = vmmov (%p547_p6), %vm3556_vm0  ;;  %v1951_v62 = vrot.slane (%p547_p6), %v1937_v3, %v3056_v13 }
  0xe8   : > { %v1896_v5 = vsel %vm3557_vm4, %v1868_v10, 0.0  ;;  %vm3559_vm1 = vmmov %vm3556_vm0  ;;  %v1936_v21 = vcombine.high %v1934_v8, %v1934_v8  ;;  %v1963_v30 = vsel %vm1768_vm12, %v1935_v37, 0.0  ;;  %v1965_v16 = vsel %vm1768_vm12, %v1934_v8, 0.0 }
  0xe9   : > { %v1898_v28 = vsel %vm3559_vm1, %v1872_v0, 0.0  ;;  %vm3560_vm7 = vmmov %vm3556_vm0  ;;  %v1964_v31 = vadd.f32 %v1963_v30, %v1962_v9  ;;  %v1953_v29 = vcombine.high %v1951_v62, %v1951_v62 }
  0xea   : > { %v1900_v56 = vsel %vm3560_vm7, %v1876_v18, 0.0 }
  0xee   : > { %v1989_v46 = vld [vmem:[#allocation4] sm:$0xff] }
  0xef   : > { %v1994_v38 = vrot.slane %v1989_v46, %v2814_v52  ;;  %v1998_v39 = vrot.slane %v1989_v46, %v2817_v53  ;;  %v2002_v45 = vrot.slane %v1989_v46, %v3543_v49  ;;  %v2006_v63 = vrot.slane %v1989_v46, %v3544_v4 }
  0xf0   : > { %v2010_v50 = vrot.slane %v1989_v46, %v3545_v42  ;;  %v2014_v11 = vrot.slane %v1989_v46, %v2831_v58  ;;  %v2018_v60 = vrot.slane %v1989_v46, %v2844_v15  ;;  %v2022_v40 = vrot.slane %v1989_v46, %v2851_v20 }
  0xf1   : > { %v2031_v2 = vsel %vm3546_vm15, %v1994_v38, 0.0  ;;  %v2032_v23 = vsel %vm3547_vm8, %v1998_v39, 0.0  ;;  %v2034_v6 = vsel %vm3548_vm9, %v2002_v45, 0.0  ;;  %v2036_v55 = vsel %vm3549_vm10, %v2006_v63, 0.0  ;;  %vm3561_vm15 = vmmov %vm3558_vm6 }
  0xf2   : > { %v2033_v54 = vadd.f32 %v2032_v23, %v2031_v2  ;;  %v2038_v7 = vsel %vm3550_vm5, %v2010_v50, 0.0  ;;  %v1891_v52 = vadd.f32 %v1890_v27, %v1889_v14  ;;  %v1892_v53 = vsel %vm3553_vm14, %v1860_v48, 0.0 }
  0xf3   : > { %v2040_v61 = vsel %vm3554_vm2, %v2014_v11, 0.0  ;;  %v2042_v43 = vsel %vm3555_vm3, %v2018_v60, 0.0  ;;  %v2044_v58 = vsel %vm3558_vm6, %v2022_v40, 0.0  ;;  %v1952_v46 = vcombine.high %v1944_v47, %v1944_v47 }
  0xf4   : > { %v2035_v32 = vadd.f32 %v2034_v6, %v2033_v54  ;;  %v1893_v24 = vadd.f32 %v1892_v53, %v1891_v52  ;;  %v1967_v20 = vsel %vm1768_vm12, %v1936_v21, 0.0  ;;  %v1902_v38 = vsel %vm3561_vm15, %v1880_v36, 0.0 }
  0xf5   : > { %v1966_v39 = vadd.f32 %v1965_v16, %v1964_v31  ;;  %v1969_v45 = vsel %vm1768_vm12, %v1944_v47, 0.0  ;;  %v1971_v13 = vsel %vm1768_vm12, %v1952_v46, 0.0  ;;  %vm1975_vm8 = vcmask 844800  }
  0xf6   : > { %v2037_v17 = vadd.f32 %v2036_v55, %v2035_v32  ;;  %v1895_v26 = vadd.f32 %v1894_v44, %v1893_v24  ;;  %v1973_v50 = vsel %vm1768_vm12, %v1951_v62, 0.0  ;;  %v1976_v23 = vsel %vm1975_vm8, %v1953_v29, 0.0 }
  0xf7   : > { %v1968_v4 = vadd.f32 %v1967_v20, %v1966_v39  ;;  %vm1914_vm12 = vcmask 0  }
  0xf8   : > { %v2039_v19 = vadd.f32 %v2038_v7, %v2037_v17  ;;  %v1897_v15 = vadd.f32 %v1896_v5, %v1895_v26 }
  0xf9   : > { %v1970_v42 = vadd.f32 %v1969_v45, %v1968_v4 }
  0xfa   : > { %v2041_v12 = vadd.f32 %v2040_v61, %v2039_v19  ;;  %v1899_v51 = vadd.f32 %v1898_v28, %v1897_v15 }
  0xfb   : > { %v1972_v2 = vadd.f32 %v1971_v13, %v1970_v42 }
  0xfc   : > { %v2043_v33 = vadd.f32 %v2042_v43, %v2041_v12  ;;  %v1901_v49 = vadd.f32 %v1900_v56, %v1899_v51 }
  0xfd   : > { %v1974_v6 = vadd.f32 %v1973_v50, %v1972_v2 }
  0xfe   : > { %v2045_v22 = vadd.f32 %v2044_v58, %v2043_v33  ;;  %v1903_v63 = vadd.f32 %v1902_v38, %v1901_v49 }
  0xff   : > { %v1977_v11 = vadd.f32 %v1976_v23, %v1974_v6 }
 0x100   : > { %2046 = vadd.xlane.f32.xlu1 %v2045_v22  ;;  %1904 = vadd.xlane.f32.xlu0 %v1903_v63 }
 0x104   : > { %1978 = vadd.xlane.f32.xlu0 %v1977_v11 }
 0x18d   : > { %v2047_v60 = vpop.xlane.xlu1 %2046  ;;  %v1905_v55 = vpop.xlane.xlu0 %1904 }
 0x18e   : > { %v2048_v54 = vrot.slane %v2047_v60, 4  ;;  %v1906_v57 = vrot.slane %v1905_v55, 4 }
 0x190   : > { %v2049_v59 = vadd.f32 %v2048_v54, %v2047_v60  ;;  %v1907_v48 = vadd.f32 %v1906_v57, %v1905_v55 }
 0x191   : > { %v1979_v7 = vpop.xlane.xlu0 %1978 }
 0x192   : > { %v1908_v32 = vrot.slane %v1907_v48, 2  ;;  %v2050_v25 = vrot.slane %v2049_v59, 2  ;;  %v1980_v14 = vrot.slane %v1979_v7, 4 }
 0x194   : > { %v1909_v10 = vadd.f32 %v1908_v32, %v1907_v48  ;;  %v1981_v1 = vadd.f32 %v1980_v14, %v1979_v7  ;;  %v2051_v40 = vadd.f32 %v2050_v25, %v2049_v59 }
 0x196   : > { %v1910_v27 = vrot.slane %v1909_v10, 1  ;;  %v1982_v52 = vrot.slane %v1981_v1, 2  ;;  %v2052_v34 = vrot.slane %v2051_v40, 1 }
 0x198   : > { %v1911_v17 = vadd.f32 %v1910_v27, %v1909_v10  ;;  %v1983_v53 = vadd.f32 %v1982_v52, %v1981_v1  ;;  %v2053_v0 = vadd.f32 %v2052_v34, %v2051_v40 }
 0x19a   : > { %2282 = vpush %v1911_v17  ;;  %v1984_v61 = vrot.slane %v1983_v53, 1 }
 0x19c   : > { %v1985_v43 = vadd.f32 %v1984_v61, %v1983_v53 }
 0x19e   : > { %2284 = vpush %v1985_v43 }
 0x19f   : > { %2286 = vpush %v2053_v0 }
 0x1cb   : > { %s2283_s24 = spop %2282 }
 0x1cc   : > { %v1913_v44 = vstv %s2283_s24 }
 0x1cd   : > { %1915 = vst.msk [vmem:[#allocation8] sm:$0x1] %vm1914_vm12, %v1913_v44 }
 0x1cf   : > { %s2285_s11 = spop %2284 }
 0x1d0   : > { %v1987_v19 = vstv %s2285_s11  ;;  %s2287_s13 = spop %2286 }
 0x1d1   : > { %1988 = vst.msk [vmem:[#allocation10] sm:$0x1] %vm1914_vm12, %v1987_v19  ;;  %v2055_v24 = vstv %s2287_s13 }
 0x1d2   : > { %2056 = vst.msk [vmem:[#allocation12] sm:$0x1] %vm1914_vm12, %v2055_v24 }
 0x1d3 PF: > { %p3368_p8 = scmp.eq.s32.totalorder %s2242_s27, 1  ;;  %s2549_s15 = smov [#allocation10]  }
 0x1d4   : > { %s2079_s16 = sshll.u32 %s2549_s15, 4  ;;  %s2080_s16 = int_to_ptr.vmem [resolvable:$true] %s2079_s16 }
 0x1d5   : > { %s2432_s17 = scalar_lea.vmem %s2080_s16, 16  ;;  %s2438_s18 = scalar_lea.vmem %s2080_s16, 32 }
 0x1d6   : > { %p2433_p9 = scmp.ne.s32.totalorder %s2080_s16, %s2432_s17  ;;  %p2439_p12 = scmp.lt.s32.totalorder %s2080_s16, %s2080_s16 }
 0x1d7   : > { %p2440_p13 = scmp.lt.s32.totalorder %s2438_s18, %s2432_s17 }
 0x1d8   : > { %p2434_p10 = pnand %p2433_p9, %p3368_p8 }
 0x1d9   : > { %p2441_p0 = por %p2440_p13, %p2439_p12 }
 0x1da   : > { %p2435_p11 = pneg %p2434_p10 }
 0x1dc   : > { %p2442_p1 = pnand %p2441_p0, %p2435_p11 }
 0x1de   : > { %2445 = shalt.err (!%p2442_p1)
}
 0x1df   : > { %s2446_s20 = scalar_lea.hbm %s3449_s6, 16 }
 0x1e0   : > { %p2447_p2 = scmp.ne.s32.totalorder %s3449_s6, %s2446_s20  ;;  %p2452_p5 = scmp.lt.u32.totalorder %s2446_s20, %s3449_s6 }
 0x1e2   : > { %p2448_p3 = pnand %p2447_p2, %p3368_p8 }
 0x1e4   : > { %p2449_p4 = pneg %p2448_p3 }
 0x1e6   : > { %p2454_p6 = pnand %p2452_p5, %p2449_p4 }
 0x1e8   : > { %2457 = shalt.err (!%p2454_p6)
}
 0x1e9   : > { %2291 = dma.vmem_to_hbm [thread:$0]  (%p3368_p8), %s2080_s16, 16, %s3449_s6, [#allocation11]  }
 0x1ea   : > { %s2550_s9 = smov [#allocation8]   ;;  %s2551_s12 = smov [#allocation12]  }
 0x1eb   : > { %s2066_s10 = sshll.u32 %s2550_s9, 4  ;;  %s2092_s24 = sshll.u32 %s2551_s12, 4  ;;  %s2067_s10 = int_to_ptr.vmem [resolvable:$true] %s2066_s10  ;;  %s2093_s24 = int_to_ptr.vmem [resolvable:$true] %s2092_s24 }
 0x1ec   : > { %s2458_s11 = scalar_lea.vmem %s2067_s10, 16  ;;  %s2464_s13 = scalar_lea.vmem %s2067_s10, 32 }
 0x1ed   : > { %p2459_p7 = scmp.ne.s32.totalorder %s2067_s10, %s2458_s11  ;;  %p2465_p11 = scmp.lt.s32.totalorder %s2067_s10, %s2067_s10 }
 0x1ee   : > { %p2466_p12 = scmp.lt.s32.totalorder %s2464_s13, %s2458_s11 }
 0x1ef   : > { %p2460_p9 = pnand %p2459_p7, %p3368_p8 }
 0x1f0   : > { %p2467_p13 = por %p2466_p12, %p2465_p11 }
 0x1f1   : > { %p2461_p10 = pneg %p2460_p9 }
 0x1f3   : > { %p2468_p0 = pnand %p2467_p13, %p2461_p10 }
 0x1f5   : > { %2471 = shalt.err (!%p2468_p0)
}
 0x1f6   : > { %s2472_s16 = scalar_lea.hbm %s3448_s5, 16 }
 0x1f7   : > { %p2473_p1 = scmp.ne.s32.totalorder %s3448_s5, %s2472_s16  ;;  %p2478_p4 = scmp.lt.u32.totalorder %s2472_s16, %s3448_s5 }
 0x1f9   : > { %p2474_p2 = pnand %p2473_p1, %p3368_p8 }
 0x1fb   : > { %p2475_p3 = pneg %p2474_p2 }
 0x1fd   : > { %p2480_p5 = pnand %p2478_p4, %p2475_p3 }
 0x1ff   : > { %2483 = shalt.err (!%p2480_p5)
}
 0x200   : > { %2289 = dma.vmem_to_hbm [thread:$0]  (%p3368_p8), %s2067_s10, 16, %s3448_s5, [#allocation9]  }
 0x201   : > { %s2484_s23 = scalar_lea.vmem %s2093_s24, 16  ;;  %s2490_s29 = scalar_lea.vmem %s2093_s24, 32 }
 0x202   : > { %p2485_p6 = scmp.ne.s32.totalorder %s2093_s24, %s2484_s23  ;;  %p2491_p10 = scmp.lt.s32.totalorder %s2093_s24, %s2093_s24 }
 0x203   : > { %p2492_p11 = scmp.lt.s32.totalorder %s2490_s29, %s2484_s23 }
 0x204   : > { %p2486_p7 = pnand %p2485_p6, %p3368_p8 }
 0x205   : > { %p2493_p12 = por %p2492_p11, %p2491_p10 }
 0x206   : > { %p2487_p9 = pneg %p2486_p7 }
 0x208   : > { %p2494_p13 = pnand %p2493_p12, %p2487_p9 }
 0x20a   : > { %2497 = shalt.err (!%p2494_p13)
}
 0x20b   : > { %s2498_s9 = scalar_lea.hbm %s3450_s7, 16 }
 0x20c   : > { %p2499_p0 = scmp.ne.s32.totalorder %s3450_s7, %s2498_s9  ;;  %p2504_p3 = scmp.lt.u32.totalorder %s2498_s9, %s3450_s7 }
 0x20e   : > { %p2500_p1 = pnand %p2499_p0, %p3368_p8 }
 0x210   : > { %p2501_p2 = pneg %p2500_p1 }
 0x212   : > { %p2506_p4 = pnand %p2504_p3, %p2501_p2 }
 0x214   : > { %2509 = shalt.err (!%p2506_p4)
}
 0x215   : > { %2293 = dma.vmem_to_hbm [thread:$0]  (%p3368_p8), %s2093_s24, 16, %s3450_s7, [#allocation11]  }
 0x216   : > { %2523 = dma.done.wait (%p3368_p8), [#allocation9], 16  }
 0x217   : > { %2525 = vsyncadd (%p3368_p8), [#allocation9], 4294967280 }
 0x218   : > { %2527 = dma.done.wait (%p3368_p8), [#allocation11], 32  }
 0x219   : > { %2529 = vsyncadd (%p3368_p8), [#allocation11], 4294967264 }
 0x21a PF: > { %s20_s26 = sadd.s32 1, %s2540_s26   ;;  %s3563_s24 = smov %s2536_s25 }
 0x21b   : > { %p17_p5 = scmp.ge.s32.totalorder %s20_s26, 4   ;;  %s3564_s25 = smov %s3566_s28 }
 0x21d   :  { %19 = sbr.rel (!%p17_p5) target bundleno = 3 (0x3), region = 110 }
 0x224   :  { %2113 = vsyncpa [#allocation9], 1 }
 0x225   :  { %2115 = vsyncpa [#allocation9 + $0x1], 1 }
 0x226   :  { %2116 = vsyncpa [#allocation11], 1 }

</bundles_post_ra>
